<compile_context>
chip_gen: v6e
topology: v6e:2x2x1
jax: 0.10.0
libtpu: 0.0.40
codegen_flags: <defaults>
</compile_context>

<pallas_src>
import functools

import jax
import jax.numpy as jnp
from jax.experimental import pallas as pl
from jax.experimental.pallas import tpu as pltpu

_K = 3            # conv kernel size (stride 1, padding 1, no bias)
_BN_EPS = 1e-5
_OUT_W = 128      # lane-dense fused head / output width (>= 11 logits)
_N_LOGITS = 11    # bowel(1) + ext(1) + kidney(3) + liver(3) + spleen(3)
_LANE = 128


def _round_up(x, m):
    return (x + m - 1) // m * m


# ----------------------------------------------------------------------------
# Pallas kernel: on-chip im2col (9 accumulating taps from 3 halo planes) +
# BN shift + ReLU + partial global-average-pool accumulation + fused heads
# (+ optional sigmoid/softmax for infer=True).  Grid = (batch, output D-plane).
# ----------------------------------------------------------------------------
def _rsna_kernel(p0_ref, p1_ref, p2_ref, w_ref, shift_ref, corr_ref,
                 hw_ref, hb_ref, out_ref, acc_ref, *, H, Wp, n_spatial, infer):
    # NOTE: init/finalize assume grid order (B outer / D inner); do not reorder.
    d = pl.program_id(1)

    @pl.when(d == 0)
    def _():
        acc_ref[...] = jnp.zeros_like(acc_ref)

    HWp = H * Wp
    planes = (p0_ref, p1_ref, p2_ref)

    # Converted-to-3D stem conv for this output D-plane: 9 accumulating
    # (c_out, C) x (C, H*Wp) bf16 MXU matmuls (kW taps already box-summed in
    # the wrapper, BN scale folded into w_ref), f32 accumulation.
    conv = None
    for kd in range(_K):
        for kh in range(_K):
            rhs = planes[kd][:, kh * Wp: kh * Wp + HWp]       # lane-aligned slice
            part = jnp.dot(w_ref[kd * _K + kh], rhs,
                           preferred_element_type=jnp.float32)
            conv = part if conv is None else conv + part

    y = jnp.maximum(conv + shift_ref[...], 0.0)               # BN shift + ReLU
    acc_ref[...] += jnp.sum(y, axis=1, keepdims=True)         # partial avg-pool sum

    @pl.when(d == pl.num_programs(1) - 1)
    def _():
        # Each zero-padded W column contributed ReLU(shift); corr removes them
        # exactly, then divide by the true spatial count.
        fea = (acc_ref[...] - corr_ref[...]) * (1.0 / n_spatial)   # (c_out, 1)
        logits = (jnp.sum(fea * hw_ref[...], axis=0, keepdims=True)
                  + hb_ref[...])                                   # (1, 128)
        if not infer:
            out_ref[...] = logits
        else:
            col = jax.lax.broadcasted_iota(jnp.int32, logits.shape, 1)

            def _group_softmax(lo, hi):
                m = (col >= lo) & (col < hi)
                zmax = jnp.max(jnp.where(m, logits, -1e30), axis=-1,
                               keepdims=True)
                e = jnp.where(m, jnp.exp(logits - zmax), 0.0)
                return e / jnp.sum(e, axis=-1, keepdims=True)

            res = jnp.where(col < 2, jax.nn.sigmoid(logits), 0.0)  # bowel, ext
            res = res + _group_softmax(2, 5)                       # kidney
            res = res + _group_softmax(5, 8)                       # liver
            res = res + _group_softmax(8, 11)                      # spleen
            out_ref[...] = res


# ----------------------------------------------------------------------------
# Parameter setup / glue (plain JAX, all fused under jax.jit).
# ----------------------------------------------------------------------------
def init_params(key, c_in=3, c_out=32, k=_K):
    keys = jax.random.split(key, 12)
    return dict(
        conv_w2d=jax.random.normal(keys[0], (c_out, c_in, k, k), jnp.float32) * 0.1,
        bn_gamma=jax.random.uniform(keys[1], (c_out,), jnp.float32, 0.5, 1.5),
        bn_beta=jax.random.normal(keys[2], (c_out,), jnp.float32) * 0.1,
        bn_mean=jax.random.normal(keys[3], (c_out,), jnp.float32) * 0.05,
        bn_var=jax.random.uniform(keys[4], (c_out,), jnp.float32, 0.5, 1.5),
        bowel_w=jax.random.normal(keys[5], (c_out, 1), jnp.float32) * 0.1,
        bowel_b=jnp.zeros((1,), jnp.float32),
        ext_w=jax.random.normal(keys[6], (c_out, 1), jnp.float32) * 0.1,
        ext_b=jnp.full((1,), 0.01, jnp.float32),
        kidney_w=jax.random.normal(keys[7], (c_out, 3), jnp.float32) * 0.1,
        kidney_b=jax.random.normal(keys[8], (3,), jnp.float32) * 0.01,
        liver_w=jax.random.normal(keys[9], (c_out, 3), jnp.float32) * 0.1,
        liver_b=jax.random.normal(keys[10], (3,), jnp.float32) * 0.01,
        spleen_w=jax.random.normal(keys[11], (c_out, 3), jnp.float32) * 0.1,
        spleen_b=jnp.zeros((3,), jnp.float32),
    )


def _fold_bn(params):
    scale = params["bn_gamma"] / jnp.sqrt(params["bn_var"] + _BN_EPS)
    shift = params["bn_beta"] - params["bn_mean"] * scale
    return scale, shift


def _head_params(params):
    head_w = jnp.concatenate(
        [params["bowel_w"], params["ext_w"], params["kidney_w"],
         params["liver_w"], params["spleen_w"]], axis=1)              # (c_out, 11)
    head_b = jnp.concatenate(
        [params["bowel_b"], params["ext_b"], params["kidney_b"],
         params["liver_b"], params["spleen_b"]], axis=0)[None, :]     # (1, 11)
    return head_w, head_b


def _prepare(x, params):
    """W box-sum, bf16 cast, D/H conv pad + W lane pad, per-plane lane-dense
    layout, BN-folded per-tap conv weights, fused lane-padded heads."""
    B, C, D, H, W = x.shape
    Wp = _round_up(W, _LANE)
    x = x.astype(jnp.float32)

    # Convert2DTo3D: Conv3d weight = 2-D kernel repeated along the new last
    # (kW) axis, so the W-axis taps reduce to a 3-tap box sum done once here.
    xw = jnp.pad(x, ((0, 0), (0, 0), (0, 0), (0, 0), (1, 1)))
    xs = (xw[..., 0:W] + xw[..., 1:W + 1] + xw[..., 2:W + 2]).astype(jnp.bfloat16)

    # Conv zero-pad D/H by 1, lane-pad W; flatten each D-plane to (C, (H+2)*Wp).
    xsp = jnp.pad(xs, ((0, 0), (0, 0), (1, 1), (1, 1), (0, Wp - W)))
    xsp = jnp.transpose(xsp, (0, 2, 1, 3, 4))           # (B, D+2, C, H+2, Wp)
    xsp = xsp.reshape(B * (D + 2), C, (H + 2) * Wp)

    # BatchNorm3d (eval): fold the scale into the conv weight, keep the shift.
    scale, shift = _fold_bn(params)
    w2d = params["conv_w2d"]                            # (c_out, C, kD, kH)
    c_out = w2d.shape[0]
    w_fold = w2d * scale[:, None, None, None]
    w_taps = jnp.transpose(w_fold, (2, 3, 0, 1)).reshape(_K * _K, c_out, C)

    # Each zero-padded W column adds ReLU(shift) to the pooled sum.
    corr = (D * H * (Wp - W)) * jnp.maximum(shift, 0.0)

    head_w, head_b = _head_params(params)
    head_w = jnp.pad(head_w, ((0, 0), (0, _OUT_W - _N_LOGITS)))
    head_b = jnp.pad(head_b, ((0, 0), (0, _OUT_W - _N_LOGITS)))

    return (xsp, w_taps.astype(jnp.bfloat16),
            shift.reshape(c_out, 1).astype(jnp.float32),
            corr.reshape(c_out, 1).astype(jnp.float32),
            head_w.astype(jnp.float32), head_b.astype(jnp.float32), Wp)


@functools.partial(jax.jit, static_argnames=("infer",))
def rsna_forward_pallas(x, params, infer=False):
    """Forward pass of RSNAModelTimm: returns (bowel, ext, kidney, liver, spleen)."""
    B, C, D, H, W = x.shape
    xsp, w_taps, shift, corr, head_w, head_b, Wp = _prepare(x, params)
    c_out = w_taps.shape[1]
    HW2p = (H + 2) * Wp
    HWp = H * Wp
    Dp2 = D + 2

    kernel = functools.partial(_rsna_kernel, H=H, Wp=Wp,
                               n_spatial=D * H * W, infer=infer)

    def _const(shape):
        return pl.BlockSpec(shape, lambda b, d: (0,) * len(shape))

    grid_spec = pltpu.PrefetchScalarGridSpec(
        num_scalar_prefetch=0,
        grid=(B, D),
        in_specs=[
            # Three overlapping halo planes (kd = 0, 1, 2) of the padded,
            # box-summed input, streamed as bf16 lane-dense slabs.
            pl.BlockSpec((None, C, HW2p), lambda b, d: (b * Dp2 + d, 0, 0)),
            pl.BlockSpec((None, C, HW2p), lambda b, d: (b * Dp2 + d + 1, 0, 0)),
            pl.BlockSpec((None, C, HW2p), lambda b, d: (b * Dp2 + d + 2, 0, 0)),
            _const((_K * _K, c_out, C)),   # BN-scale-folded per-tap conv weights
            _const((c_out, 1)),            # BN shift
            _const((c_out, 1)),            # W-pad correction
            _const((c_out, _OUT_W)),       # fused, lane-padded head weights
            _const((1, _OUT_W)),           # fused head bias
        ],
        out_specs=pl.BlockSpec((None, 1, _OUT_W), lambda b, d: (b, 0, 0)),
        scratch_shapes=[pltpu.VMEM((c_out, 1), jnp.float32)],
    )

    # VMEM: 3 halo specs x double-buffered bf16 slabs (sublane-padded to 16)
    # + f32 conv/ReLU intermediates + consts/headroom; capped < v7x 64 MiB.
    vmem_bytes = 3 * 2 * 16 * HW2p * 2 + 4 * c_out * HWp * 4 + (6 << 20)
    vmem_bytes = int(min(max(vmem_bytes, 16 << 20), 56 << 20))

    out = pl.pallas_call(
        kernel,
        grid_spec=grid_spec,
        out_shape=jax.ShapeDtypeStruct((B, 1, _OUT_W), jnp.float32),
        compiler_params=pltpu.CompilerParams(
            dimension_semantics=("parallel", "arbitrary"),
            vmem_limit_bytes=vmem_bytes),
    )(xsp, xsp, xsp, w_taps, shift, corr, head_w, head_b)

    out = out[:, 0, :]
    return (out[:, 0:1], out[:, 1:2], out[:, 2:5], out[:, 5:8], out[:, 8:11])


# ----------------------------------------------------------------------------
# Pure-JAX references (correctness checking only).
# ----------------------------------------------------------------------------
def _split_heads(logits, infer):
    b, ex = logits[:, 0:1], logits[:, 1:2]
    kd, lv, sp = logits[:, 2:5], logits[:, 5:8], logits[:, 8:11]
    if infer:
        b, ex = jax.nn.sigmoid(b), jax.nn.sigmoid(ex)
        kd = jax.nn.softmax(kd, axis=1)
        lv = jax.nn.softmax(lv, axis=1)
        sp = jax.nn.softmax(sp, axis=1)
    return b, ex, kd, lv, sp


def rsna_forward_ref_pipeline(x, params, infer=False):
    """Reference on the exact kernel inputs (same bf16 rounding) -> tight tol."""
    B, C, D, H, W = x.shape
    xsp, w_taps, shift, corr, head_w, head_b, Wp = _prepare(x, params)
    c_out = w_taps.shape[1]
    HWp = H * Wp
    xspf = xsp.reshape(B, D + 2, C, (H + 2) * Wp).astype(jnp.float32)
    wt = w_taps.astype(jnp.float32)
    conv = jnp.zeros((B, D, c_out, HWp), jnp.float32)
    for kd in range(_K):
        for kh in range(_K):
            rhs = xspf[:, kd:kd + D, :, kh * Wp: kh * Wp + HWp]
            conv = conv + jnp.einsum("oc,bdcn->bdon", wt[kd * _K + kh], rhs,
                                     precision=jax.lax.Precision.HIGHEST)
    y = jnp.maximum(conv + shift[None, None], 0.0)
    fea = (jnp.sum(y, axis=(1, 3)) - corr[None, :, 0]) * (1.0 / (D * H * W))
    logits = jnp.dot(fea, head_w, precision=jax.lax.Precision.HIGHEST) + head_b
    return _split_heads(logits[:, :_N_LOGITS], infer)


def rsna_forward_ref_module(x, params, infer=False):
    """Module-faithful f32 reference: Conv3d (repeated 2D weight), BN eval,
    ReLU, AdaptiveAvgPool3d(1), five linear heads."""
    w2d = params["conv_w2d"]
    w3d = jnp.repeat(w2d[..., None], _K, axis=4)        # unsqueeze(4).repeat(..,k)
    conv = jax.lax.conv_general_dilated(
        x.astype(jnp.float32), w3d.astype(jnp.float32),
        window_strides=(1, 1, 1), padding=((1, 1), (1, 1), (1, 1)),
        dimension_numbers=("NCDHW", "OIDHW", "NCDHW"),
        precision=jax.lax.Precision.HIGHEST)
    scale, shift = _fold_bn(params)
    y = jnp.maximum(conv * scale[None, :, None, None, None]
                    + shift[None, :, None, None, None], 0.0)
    fea = jnp.mean(y, axis=(2, 3, 4))                   # (B, c_out)
    head_w, head_b = _head_params(params)
    logits = jnp.dot(fea, head_w, precision=jax.lax.Precision.HIGHEST) + head_b
    return _split_heads(logits, infer)


if __name__ == "__main__":
    key = jax.random.PRNGKey(0)
    kx1, kx2, kp = jax.random.split(key, 3)
    params = init_params(kp, c_in=3, c_out=32, k=_K)

    def _check(x, infer):
        outs = jax.block_until_ready(
            rsna_forward_pallas(x, params, infer=infer))
        refs_p = rsna_forward_ref_pipeline(x, params, infer=infer)
        refs_m = rsna_forward_ref_module(x, params, infer=infer)
        B = x.shape[0]
        shapes = [(B, 1), (B, 1), (B, 3), (B, 3), (B, 3)]
        for o, rp, rm, s in zip(outs, refs_p, refs_m, shapes):
            assert o.shape == s, (o.shape, s)
            # Same-precision (bf16-matched) reference: tight tolerance.
            assert float(jnp.max(jnp.abs(o - rp))) < 1e-4
            # Module-faithful f32 reference: tolerance covers the bf16 cast.
            assert float(jnp.max(jnp.abs(o - rm))) < 2e-2

    # Case 1: multi-plane accumulation (grid (2, 8)), inference path.
    x1 = jax.random.normal(kx1, (2, 3, 8, 8, 8), jnp.float32)
    _check(x1, infer=True)

    # Case 2: W not a multiple of 128 (exercises the lane-pad correction) and
    # the raw-logit (infer=False) path.
    x2 = jax.random.normal(kx2, (2, 3, 6, 10, 10), jnp.float32)
    _check(x2, infer=False)

    print("KERNEL_OK")
</pallas_src>

<mosaic_0001>
module attributes {stable_mosaic.version = 11 : i64} {
  func.func @_rsna_kernel(%arg0: i32, %arg1: i32, %arg2: memref<1x3x1280xbf16, #tpu.memory_space<vmem>>, %arg3: memref<1x3x1280xbf16, #tpu.memory_space<vmem>>, %arg4: memref<1x3x1280xbf16, #tpu.memory_space<vmem>>, %arg5: memref<9x32x3xbf16, #tpu.memory_space<vmem>>, %arg6: memref<32x1xf32, #tpu.memory_space<vmem>>, %arg7: memref<32x1xf32, #tpu.memory_space<vmem>>, %arg8: memref<32x128xf32, #tpu.memory_space<vmem>>, %arg9: memref<1x128xf32, #tpu.memory_space<vmem>>, %arg10: memref<1x1x128xf32, #tpu.memory_space<vmem>>, %arg11: memref<32x1xf32, #tpu.memory_space<vmem>>) attributes {dimension_semantics = [#tpu.dimension_semantics<parallel>, #tpu.dimension_semantics<arbitrary>], iteration_bounds = array<i64: 2, 8>, scalar_prefetch = 0 : i64, scratch_operands = 1 : i64, tpu.core_type = #tpu.core_type<tc>, window_params = [{transform_indices = @transform_0, window_bounds = array<i64: 1, 3, 1280>}, {transform_indices = @transform_1, window_bounds = array<i64: 1, 3, 1280>}, {transform_indices = @transform_2, window_bounds = array<i64: 1, 3, 1280>}, {pipeline_mode = #tpu.pipeline_mode<synchronous>, transform_indices = @transform_3, window_bounds = array<i64: 9, 32, 3>}, {pipeline_mode = #tpu.pipeline_mode<synchronous>, transform_indices = @transform_4, window_bounds = array<i64: 32, 1>}, {pipeline_mode = #tpu.pipeline_mode<synchronous>, transform_indices = @transform_5, window_bounds = array<i64: 32, 1>}, {pipeline_mode = #tpu.pipeline_mode<synchronous>, transform_indices = @transform_6, window_bounds = array<i64: 32, 128>}, {pipeline_mode = #tpu.pipeline_mode<synchronous>, transform_indices = @transform_7, window_bounds = array<i64: 1, 128>}, {transform_indices = @transform_8, window_bounds = array<i64: 1, 1, 128>}]} {
    %c0_i32 = arith.constant 0 : i32
    %0 = arith.cmpi eq, %arg1, %c0_i32 : i32
    %1 = arith.extui %0 : i1 to i32
    %c0_i32_0 = arith.constant 0 : i32
    %2 = arith.cmpi ne, %1, %c0_i32_0 : i32
    scf.if %2 {
      %cst_61 = arith.constant 0.000000e+00 : f32
      %69 = vector.broadcast %cst_61 : f32 to vector<32x1xf32>
      %c0_62 = arith.constant 0 : index
      %c0_63 = arith.constant 0 : index
      %70 = vector.load %arg11[%c0_62, %c0_63] : memref<32x1xf32, #tpu.memory_space<vmem>>, vector<32x1xf32>
      tpu.vector_store %arg11[%c0_62, %c0_63], %69 {strides = array<i32>} : memref<32x1xf32, #tpu.memory_space<vmem>>, vector<32x1xf32>,
    } else {
    }
    %c0 = arith.constant 0 : index
    %c0_1 = arith.constant 0 : index
    %c0_2 = arith.constant 0 : index
    %3 = vector.load %arg2[%c0, %c0_1, %c0_2] : memref<1x3x1280xbf16, #tpu.memory_space<vmem>>, vector<1x3x1024xbf16>
    %4 = vector.shape_cast %3 : vector<1x3x1024xbf16> to vector<3x1024xbf16>
    %c0_3 = arith.constant 0 : index
    %c0_4 = arith.constant 0 : index
    %c0_5 = arith.constant 0 : index
    %5 = vector.load %arg5[%c0_3, %c0_4, %c0_5] : memref<9x32x3xbf16, #tpu.memory_space<vmem>>, vector<1x32x3xbf16>
    %6 = vector.shape_cast %5 : vector<1x32x3xbf16> to vector<32x3xbf16>
    %cst = arith.constant dense<0.000000e+00> : vector<32x1024xf32>
    %7 = tpu.matmul %6, %4, %cst {dimension_numbers = #tpu.dot_dimension_numbers<[1], [0], [0], [1], [0, 0, 1, 1], [], []>} : vector<32x3xbf16>, vector<3x1024xbf16>, vector<32x1024xf32> -> vector<32x1024xf32>
    %c0_6 = arith.constant 0 : index
    %c0_7 = arith.constant 0 : index
    %c128 = arith.constant 128 : index
    %8 = vector.load %arg2[%c0_6, %c0_7, %c128] : memref<1x3x1280xbf16, #tpu.memory_space<vmem>>, vector<1x3x1024xbf16>
    %9 = vector.shape_cast %8 : vector<1x3x1024xbf16> to vector<3x1024xbf16>
    %c1 = arith.constant 1 : index
    %c0_8 = arith.constant 0 : index
    %c0_9 = arith.constant 0 : index
    %10 = vector.load %arg5[%c1, %c0_8, %c0_9] : memref<9x32x3xbf16, #tpu.memory_space<vmem>>, vector<1x32x3xbf16>
    %11 = vector.shape_cast %10 : vector<1x32x3xbf16> to vector<32x3xbf16>
    %cst_10 = arith.constant dense<0.000000e+00> : vector<32x1024xf32>
    %12 = tpu.matmul %11, %9, %cst_10 {dimension_numbers = #tpu.dot_dimension_numbers<[1], [0], [0], [1], [0, 0, 1, 1], [], []>} : vector<32x3xbf16>, vector<3x1024xbf16>, vector<32x1024xf32> -> vector<32x1024xf32>
    %13 = arith.addf %7, %12 : vector<32x1024xf32>
    %c0_11 = arith.constant 0 : index
    %c0_12 = arith.constant 0 : index
    %c256 = arith.constant 256 : index
    %14 = vector.load %arg2[%c0_11, %c0_12, %c256] : memref<1x3x1280xbf16, #tpu.memory_space<vmem>>, vector<1x3x1024xbf16>
    %15 = vector.shape_cast %14 : vector<1x3x1024xbf16> to vector<3x1024xbf16>
    %c2 = arith.constant 2 : index
    %c0_13 = arith.constant 0 : index
    %c0_14 = arith.constant 0 : index
    %16 = vector.load %arg5[%c2, %c0_13, %c0_14] : memref<9x32x3xbf16, #tpu.memory_space<vmem>>, vector<1x32x3xbf16>
    %17 = vector.shape_cast %16 : vector<1x32x3xbf16> to vector<32x3xbf16>
    %cst_15 = arith.constant dense<0.000000e+00> : vector<32x1024xf32>
    %18 = tpu.matmul %17, %15, %cst_15 {dimension_numbers = #tpu.dot_dimension_numbers<[1], [0], [0], [1], [0, 0, 1, 1], [], []>} : vector<32x3xbf16>, vector<3x1024xbf16>, vector<32x1024xf32> -> vector<32x1024xf32>
    %19 = arith.addf %13, %18 : vector<32x1024xf32>
    %c0_16 = arith.constant 0 : index
    %c0_17 = arith.constant 0 : index
    %c0_18 = arith.constant 0 : index
    %20 = vector.load %arg3[%c0_16, %c0_17, %c0_18] : memref<1x3x1280xbf16, #tpu.memory_space<vmem>>, vector<1x3x1024xbf16>
    %21 = vector.shape_cast %20 : vector<1x3x1024xbf16> to vector<3x1024xbf16>
    %c3 = arith.constant 3 : index
    %c0_19 = arith.constant 0 : index
    %c0_20 = arith.constant 0 : index
    %22 = vector.load %arg5[%c3, %c0_19, %c0_20] : memref<9x32x3xbf16, #tpu.memory_space<vmem>>, vector<1x32x3xbf16>
    %23 = vector.shape_cast %22 : vector<1x32x3xbf16> to vector<32x3xbf16>
    %cst_21 = arith.constant dense<0.000000e+00> : vector<32x1024xf32>
    %24 = tpu.matmul %23, %21, %cst_21 {dimension_numbers = #tpu.dot_dimension_numbers<[1], [0], [0], [1], [0, 0, 1, 1], [], []>} : vector<32x3xbf16>, vector<3x1024xbf16>, vector<32x1024xf32> -> vector<32x1024xf32>
    %25 = arith.addf %19, %24 : vector<32x1024xf32>
    %c0_22 = arith.constant 0 : index
    %c0_23 = arith.constant 0 : index
    %c128_24 = arith.constant 128 : index
    %26 = vector.load %arg3[%c0_22, %c0_23, %c128_24] : memref<1x3x1280xbf16, #tpu.memory_space<vmem>>, vector<1x3x1024xbf16>
    %27 = vector.shape_cast %26 : vector<1x3x1024xbf16> to vector<3x1024xbf16>
    %c4 = arith.constant 4 : index
    %c0_25 = arith.constant 0 : index
    %c0_26 = arith.constant 0 : index
    %28 = vector.load %arg5[%c4, %c0_25, %c0_26] : memref<9x32x3xbf16, #tpu.memory_space<vmem>>, vector<1x32x3xbf16>
    %29 = vector.shape_cast %28 : vector<1x32x3xbf16> to vector<32x3xbf16>
    %cst_27 = arith.constant dense<0.000000e+00> : vector<32x1024xf32>
    %30 = tpu.matmul %29, %27, %cst_27 {dimension_numbers = #tpu.dot_dimension_numbers<[1], [0], [0], [1], [0, 0, 1, 1], [], []>} : vector<32x3xbf16>, vector<3x1024xbf16>, vector<32x1024xf32> -> vector<32x1024xf32>
    %31 = arith.addf %25, %30 : vector<32x1024xf32>
    %c0_28 = arith.constant 0 : index
    %c0_29 = arith.constant 0 : index
    %c256_30 = arith.constant 256 : index
    %32 = vector.load %arg3[%c0_28, %c0_29, %c256_30] : memref<1x3x1280xbf16, #tpu.memory_space<vmem>>, vector<1x3x1024xbf16>
    %33 = vector.shape_cast %32 : vector<1x3x1024xbf16> to vector<3x1024xbf16>
    %c5 = arith.constant 5 : index
    %c0_31 = arith.constant 0 : index
    %c0_32 = arith.constant 0 : index
    %34 = vector.load %arg5[%c5, %c0_31, %c0_32] : memref<9x32x3xbf16, #tpu.memory_space<vmem>>, vector<1x32x3xbf16>
    %35 = vector.shape_cast %34 : vector<1x32x3xbf16> to vector<32x3xbf16>
    %cst_33 = arith.constant dense<0.000000e+00> : vector<32x1024xf32>
    %36 = tpu.matmul %35, %33, %cst_33 {dimension_numbers = #tpu.dot_dimension_numbers<[1], [0], [0], [1], [0, 0, 1, 1], [], []>} : vector<32x3xbf16>, vector<3x1024xbf16>, vector<32x1024xf32> -> vector<32x1024xf32>
    %37 = arith.addf %31, %36 : vector<32x1024xf32>
    %c0_34 = arith.constant 0 : index
    %c0_35 = arith.constant 0 : index
    %c0_36 = arith.constant 0 : index
    %38 = vector.load %arg4[%c0_34, %c0_35, %c0_36] : memref<1x3x1280xbf16, #tpu.memory_space<vmem>>, vector<1x3x1024xbf16>
    %39 = vector.shape_cast %38 : vector<1x3x1024xbf16> to vector<3x1024xbf16>
    %c6 = arith.constant 6 : index
    %c0_37 = arith.constant 0 : index
    %c0_38 = arith.constant 0 : index
    %40 = vector.load %arg5[%c6, %c0_37, %c0_38] : memref<9x32x3xbf16, #tpu.memory_space<vmem>>, vector<1x32x3xbf16>
    %41 = vector.shape_cast %40 : vector<1x32x3xbf16> to vector<32x3xbf16>
    %cst_39 = arith.constant dense<0.000000e+00> : vector<32x1024xf32>
    %42 = tpu.matmul %41, %39, %cst_39 {dimension_numbers = #tpu.dot_dimension_numbers<[1], [0], [0], [1], [0, 0, 1, 1], [], []>} : vector<32x3xbf16>, vector<3x1024xbf16>, vector<32x1024xf32> -> vector<32x1024xf32>
    %43 = arith.addf %37, %42 : vector<32x1024xf32>
    %c0_40 = arith.constant 0 : index
    %c0_41 = arith.constant 0 : index
    %c128_42 = arith.constant 128 : index
    %44 = vector.load %arg4[%c0_40, %c0_41, %c128_42] : memref<1x3x1280xbf16, #tpu.memory_space<vmem>>, vector<1x3x1024xbf16>
    %45 = vector.shape_cast %44 : vector<1x3x1024xbf16> to vector<3x1024xbf16>
    %c7 = arith.constant 7 : index
    %c0_43 = arith.constant 0 : index
    %c0_44 = arith.constant 0 : index
    %46 = vector.load %arg5[%c7, %c0_43, %c0_44] : memref<9x32x3xbf16, #tpu.memory_space<vmem>>, vector<1x32x3xbf16>
    %47 = vector.shape_cast %46 : vector<1x32x3xbf16> to vector<32x3xbf16>
    %cst_45 = arith.constant dense<0.000000e+00> : vector<32x1024xf32>
    %48 = tpu.matmul %47, %45, %cst_45 {dimension_numbers = #tpu.dot_dimension_numbers<[1], [0], [0], [1], [0, 0, 1, 1], [], []>} : vector<32x3xbf16>, vector<3x1024xbf16>, vector<32x1024xf32> -> vector<32x1024xf32>
    %49 = arith.addf %43, %48 : vector<32x1024xf32>
    %c0_46 = arith.constant 0 : index
    %c0_47 = arith.constant 0 : index
    %c256_48 = arith.constant 256 : index
    %50 = vector.load %arg4[%c0_46, %c0_47, %c256_48] : memref<1x3x1280xbf16, #tpu.memory_space<vmem>>, vector<1x3x1024xbf16>
    %51 = vector.shape_cast %50 : vector<1x3x1024xbf16> to vector<3x1024xbf16>
    %c8 = arith.constant 8 : index
    %c0_49 = arith.constant 0 : index
    %c0_50 = arith.constant 0 : index
    %52 = vector.load %arg5[%c8, %c0_49, %c0_50] : memref<9x32x3xbf16, #tpu.memory_space<vmem>>, vector<1x32x3xbf16>
    %53 = vector.shape_cast %52 : vector<1x32x3xbf16> to vector<32x3xbf16>
    %cst_51 = arith.constant dense<0.000000e+00> : vector<32x1024xf32>
    %54 = tpu.matmul %53, %51, %cst_51 {dimension_numbers = #tpu.dot_dimension_numbers<[1], [0], [0], [1], [0, 0, 1, 1], [], []>} : vector<32x3xbf16>, vector<3x1024xbf16>, vector<32x1024xf32> -> vector<32x1024xf32>
    %55 = arith.addf %49, %54 : vector<32x1024xf32>
    %c0_52 = arith.constant 0 : index
    %c0_53 = arith.constant 0 : index
    %56 = vector.load %arg6[%c0_52, %c0_53] : memref<32x1xf32, #tpu.memory_space<vmem>>, vector<32x1xf32>
    %57 = vector.broadcast %56 : vector<32x1xf32> to vector<32x1024xf32>
    %58 = arith.addf %55, %57 : vector<32x1024xf32>
    %cst_54 = arith.constant 0.000000e+00 : f32
    %59 = vector.broadcast %cst_54 : f32 to vector<32x1024xf32>
    %60 = arith.maximumf %58, %59 : vector<32x1024xf32>
    %c0_55 = arith.constant 0 : index
    %c0_56 = arith.constant 0 : index
    %61 = vector.load %arg11[%c0_55, %c0_56] : memref<32x1xf32, #tpu.memory_space<vmem>>, vector<32x1xf32>
    %cst_57 = arith.constant dense<0.000000e+00> : vector<32xf32>
    %62 = vector.multi_reduction <add>, %60, %cst_57 [1] : vector<32x1024xf32> to vector<32xf32>
    %63 = vector.shape_cast %62 : vector<32xf32> to vector<32x1xf32>
    %64 = arith.addf %61, %63 : vector<32x1xf32>
    %c0_58 = arith.constant 0 : index
    %c0_59 = arith.constant 0 : index
    %65 = vector.load %arg11[%c0_58, %c0_59] : memref<32x1xf32, #tpu.memory_space<vmem>>, vector<32x1xf32>
    tpu.vector_store %arg11[%c0_58, %c0_59], %64 {strides = array<i32>} : memref<32x1xf32, #tpu.memory_space<vmem>>, vector<32x1xf32>,
    %c7_i32 = arith.constant 7 : i32
    %66 = arith.cmpi eq, %arg1, %c7_i32 : i32
    %67 = arith.extui %66 : i1 to i32
    %c0_i32_60 = arith.constant 0 : i32
    %68 = arith.cmpi ne, %67, %c0_i32_60 : i32
    scf.if %68 {
      %c0_61 = arith.constant 0 : index
      %c0_62 = arith.constant 0 : index
      %69 = vector.load %arg11[%c0_61, %c0_62] : memref<32x1xf32, #tpu.memory_space<vmem>>, vector<32x1xf32>
      %c0_63 = arith.constant 0 : index
      %c0_64 = arith.constant 0 : index
      %70 = vector.load %arg7[%c0_63, %c0_64] : memref<32x1xf32, #tpu.memory_space<vmem>>, vector<32x1xf32>
      %71 = arith.subf %69, %70 : vector<32x1xf32>
      %cst_65 = arith.constant 0.001953125 : f32
      %72 = vector.broadcast %cst_65 : f32 to vector<32x1xf32>
      %73 = arith.mulf %71, %72 : vector<32x1xf32>
      %c0_66 = arith.constant 0 : index
      %c0_67 = arith.constant 0 : index
      %74 = vector.load %arg8[%c0_66, %c0_67] : memref<32x128xf32, #tpu.memory_space<vmem>>, vector<32x128xf32>
      %75 = vector.broadcast %73 : vector<32x1xf32> to vector<32x128xf32>
      %76 = arith.mulf %75, %74 : vector<32x128xf32>
      %cst_68 = arith.constant dense<0.000000e+00> : vector<128xf32>
      %77 = vector.multi_reduction <add>, %76, %cst_68 [0] : vector<32x128xf32> to vector<128xf32>
      %78 = vector.shape_cast %77 : vector<128xf32> to vector<1x128xf32>
      %c0_69 = arith.constant 0 : index
      %c0_70 = arith.constant 0 : index
      %79 = vector.load %arg9[%c0_69, %c0_70] : memref<1x128xf32, #tpu.memory_space<vmem>>, vector<1x128xf32>
      %80 = arith.addf %78, %79 : vector<1x128xf32>
      %81 = tpu.iota {dimensions = array<i32: 1>} : vector<1x128xi32>
      %c2_i32 = arith.constant 2 : i32
      %82 = vector.broadcast %c2_i32 : i32 to vector<1x128xi32>
      %83 = arith.cmpi slt, %81, %82 : vector<1x128xi32>
      %84 = arith.negf %80 : vector<1x128xf32>
      %85 = math.exp %84 : vector<1x128xf32>
      %cst_71 = arith.constant 1.000000e+00 : f32
      %86 = vector.broadcast %cst_71 : f32 to vector<1x128xf32>
      %87 = arith.addf %86, %85 : vector<1x128xf32>
      %88 = arith.divf %86, %87 : vector<1x128xf32>
      %cst_72 = arith.constant 0.000000e+00 : f32
      %89 = vector.broadcast %cst_72 : f32 to vector<1x128xf32>
      %90 = arith.select %83, %88, %89 : vector<1x128xi1>, vector<1x128xf32>
      %c2_i32_73 = arith.constant 2 : i32
      %91 = vector.broadcast %c2_i32_73 : i32 to vector<1x128xi32>
      %92 = arith.cmpi sge, %81, %91 : vector<1x128xi32>
      %c5_i32 = arith.constant 5 : i32
      %93 = vector.broadcast %c5_i32 : i32 to vector<1x128xi32>
      %94 = arith.cmpi slt, %81, %93 : vector<1x128xi32>
      %95 = arith.andi %92, %94 : vector<1x128xi1>
      %cst_74 = arith.constant -1.000000e+30 : f32
      %96 = vector.broadcast %cst_74 : f32 to vector<1x128xf32>
      %97 = arith.select %95, %80, %96 : vector<1x128xi1>, vector<1x128xf32>
      %cst_75 = arith.constant dense<0xFF800000> : vector<1xf32>
      %98 = vector.multi_reduction <maximumf>, %97, %cst_75 [1] : vector<1x128xf32> to vector<1xf32>
      %99 = vector.shape_cast %98 : vector<1xf32> to vector<1x1xf32>
      %100 = vector.broadcast %99 : vector<1x1xf32> to vector<1x128xf32>
      %101 = arith.subf %80, %100 : vector<1x128xf32>
      %102 = math.exp %101 : vector<1x128xf32>
      %cst_76 = arith.constant 0.000000e+00 : f32
      %103 = vector.broadcast %cst_76 : f32 to vector<1x128xf32>
      %104 = arith.select %95, %102, %103 : vector<1x128xi1>, vector<1x128xf32>
      %cst_77 = arith.constant dense<0.000000e+00> : vector<1xf32>
      %105 = vector.multi_reduction <add>, %104, %cst_77 [1] : vector<1x128xf32> to vector<1xf32>
      %106 = vector.shape_cast %105 : vector<1xf32> to vector<1x1xf32>
      %107 = vector.broadcast %106 : vector<1x1xf32> to vector<1x128xf32>
      %108 = arith.divf %104, %107 : vector<1x128xf32>
      %109 = arith.addf %90, %108 : vector<1x128xf32>
      %c5_i32_78 = arith.constant 5 : i32
      %110 = vector.broadcast %c5_i32_78 : i32 to vector<1x128xi32>
      %111 = arith.cmpi sge, %81, %110 : vector<1x128xi32>
      %c8_i32 = arith.constant 8 : i32
      %112 = vector.broadcast %c8_i32 : i32 to vector<1x128xi32>
      %113 = arith.cmpi slt, %81, %112 : vector<1x128xi32>
      %114 = arith.andi %111, %113 : vector<1x128xi1>
      %cst_79 = arith.constant -1.000000e+30 : f32
      %115 = vector.broadcast %cst_79 : f32 to vector<1x128xf32>
      %116 = arith.select %114, %80, %115 : vector<1x128xi1>, vector<1x128xf32>
      %cst_80 = arith.constant dense<0xFF800000> : vector<1xf32>
      %117 = vector.multi_reduction <maximumf>, %116, %cst_80 [1] : vector<1x128xf32> to vector<1xf32>
      %118 = vector.shape_cast %117 : vector<1xf32> to vector<1x1xf32>
      %119 = vector.broadcast %118 : vector<1x1xf32> to vector<1x128xf32>
      %120 = arith.subf %80, %119 : vector<1x128xf32>
      %121 = math.exp %120 : vector<1x128xf32>
      %cst_81 = arith.constant 0.000000e+00 : f32
      %122 = vector.broadcast %cst_81 : f32 to vector<1x128xf32>
      %123 = arith.select %114, %121, %122 : vector<1x128xi1>, vector<1x128xf32>
      %cst_82 = arith.constant dense<0.000000e+00> : vector<1xf32>
      %124 = vector.multi_reduction <add>, %123, %cst_82 [1] : vector<1x128xf32> to vector<1xf32>
      %125 = vector.shape_cast %124 : vector<1xf32> to vector<1x1xf32>
      %126 = vector.broadcast %125 : vector<1x1xf32> to vector<1x128xf32>
      %127 = arith.divf %123, %126 : vector<1x128xf32>
      %128 = arith.addf %109, %127 : vector<1x128xf32>
      %c8_i32_83 = arith.constant 8 : i32
      %129 = vector.broadcast %c8_i32_83 : i32 to vector<1x128xi32>
      %130 = arith.cmpi sge, %81, %129 : vector<1x128xi32>
      %c11_i32 = arith.constant 11 : i32
      %131 = vector.broadcast %c11_i32 : i32 to vector<1x128xi32>
      %132 = arith.cmpi slt, %81, %131 : vector<1x128xi32>
      %133 = arith.andi %130, %132 : vector<1x128xi1>
      %cst_84 = arith.constant -1.000000e+30 : f32
      %134 = vector.broadcast %cst_84 : f32 to vector<1x128xf32>
      %135 = arith.select %133, %80, %134 : vector<1x128xi1>, vector<1x128xf32>
      %cst_85 = arith.constant dense<0xFF800000> : vector<1xf32>
      %136 = vector.multi_reduction <maximumf>, %135, %cst_85 [1] : vector<1x128xf32> to vector<1xf32>
      %137 = vector.shape_cast %136 : vector<1xf32> to vector<1x1xf32>
      %138 = vector.broadcast %137 : vector<1x1xf32> to vector<1x128xf32>
      %139 = arith.subf %80, %138 : vector<1x128xf32>
      %140 = math.exp %139 : vector<1x128xf32>
      %cst_86 = arith.constant 0.000000e+00 : f32
      %141 = vector.broadcast %cst_86 : f32 to vector<1x128xf32>
      %142 = arith.select %133, %140, %141 : vector<1x128xi1>, vector<1x128xf32>
      %cst_87 = arith.constant dense<0.000000e+00> : vector<1xf32>
      %143 = vector.multi_reduction <add>, %142, %cst_87 [1] : vector<1x128xf32> to vector<1xf32>
      %144 = vector.shape_cast %143 : vector<1xf32> to vector<1x1xf32>
      %145 = vector.broadcast %144 : vector<1x1xf32> to vector<1x128xf32>
      %146 = arith.divf %142, %145 : vector<1x128xf32>
      %147 = arith.addf %128, %146 : vector<1x128xf32>
      %c0_88 = arith.constant 0 : index
      %c0_89 = arith.constant 0 : index
      %c0_90 = arith.constant 0 : index
      %148 = vector.load %arg10[%c0_88, %c0_89, %c0_90] : memref<1x1x128xf32, #tpu.memory_space<vmem>>, vector<1x1x128xf32>
      %149 = vector.shape_cast %148 : vector<1x1x128xf32> to vector<1x128xf32>
      %150 = vector.shape_cast %147 : vector<1x128xf32> to vector<1x1x128xf32>
      tpu.vector_store %arg10[%c0_88, %c0_89, %c0_90], %150 {strides = array<i32>} : memref<1x1x128xf32, #tpu.memory_space<vmem>>, vector<1x1x128xf32>,
    } else {
    }
    return
  }
  func.func @transform_0(%arg0: i32, %arg1: i32) -> (i32, i32, i32) {
    %c10_i32 = arith.constant 10 : i32
    %0 = arith.muli %arg0, %c10_i32 : i32
    %1 = arith.addi %0, %arg1 : i32
    %c0_i32 = arith.constant 0 : i32
    %c0_i32_0 = arith.constant 0 : i32
    %c0_i32_1 = arith.constant 0 : i32
    return %1, %c0_i32, %c0_i32_0 : i32, i32, i32
  }
  func.func @transform_1(%arg0: i32, %arg1: i32) -> (i32, i32, i32) {
    %c10_i32 = arith.constant 10 : i32
    %0 = arith.muli %arg0, %c10_i32 : i32
    %1 = arith.addi %0, %arg1 : i32
    %c1_i32 = arith.constant 1 : i32
    %2 = arith.addi %1, %c1_i32 : i32
    %c0_i32 = arith.constant 0 : i32
    %c0_i32_0 = arith.constant 0 : i32
    %c0_i32_1 = arith.constant 0 : i32
    return %2, %c0_i32, %c0_i32_0 : i32, i32, i32
  }
  func.func @transform_2(%arg0: i32, %arg1: i32) -> (i32, i32, i32) {
    %c10_i32 = arith.constant 10 : i32
    %0 = arith.muli %arg0, %c10_i32 : i32
    %1 = arith.addi %0, %arg1 : i32
    %c2_i32 = arith.constant 2 : i32
    %2 = arith.addi %1, %c2_i32 : i32
    %c0_i32 = arith.constant 0 : i32
    %c0_i32_0 = arith.constant 0 : i32
    %c0_i32_1 = arith.constant 0 : i32
    return %2, %c0_i32, %c0_i32_0 : i32, i32, i32
  }
  func.func @transform_3(%arg0: i32, %arg1: i32) -> (i32, i32, i32) {
    %c0_i32 = arith.constant 0 : i32
    %c0_i32_0 = arith.constant 0 : i32
    %c0_i32_1 = arith.constant 0 : i32
    %c0_i32_2 = arith.constant 0 : i32
    return %c0_i32, %c0_i32_0, %c0_i32_1 : i32, i32, i32
  }
  func.func @transform_4(%arg0: i32, %arg1: i32) -> (i32, i32) {
    %c0_i32 = arith.constant 0 : i32
    %c0_i32_0 = arith.constant 0 : i32
    %c0_i32_1 = arith.constant 0 : i32
    return %c0_i32, %c0_i32_0 : i32, i32
  }
  func.func @transform_5(%arg0: i32, %arg1: i32) -> (i32, i32) {
    %c0_i32 = arith.constant 0 : i32
    %c0_i32_0 = arith.constant 0 : i32
    %c0_i32_1 = arith.constant 0 : i32
    return %c0_i32, %c0_i32_0 : i32, i32
  }
  func.func @transform_6(%arg0: i32, %arg1: i32) -> (i32, i32) {
    %c0_i32 = arith.constant 0 : i32
    %c0_i32_0 = arith.constant 0 : i32
    %c0_i32_1 = arith.constant 0 : i32
    return %c0_i32, %c0_i32_0 : i32, i32
  }
  func.func @transform_7(%arg0: i32, %arg1: i32) -> (i32, i32) {
    %c0_i32 = arith.constant 0 : i32
    %c0_i32_0 = arith.constant 0 : i32
    %c0_i32_1 = arith.constant 0 : i32
    return %c0_i32, %c0_i32_0 : i32, i32
  }
  func.func @transform_8(%arg0: i32, %arg1: i32) -> (i32, i32, i32) {
    %c0_i32 = arith.constant 0 : i32
    %c0_i32_0 = arith.constant 0 : i32
    %c0_i32_1 = arith.constant 0 : i32
    return %arg0, %c0_i32, %c0_i32_0 : i32, i32, i32
  }
}

</mosaic_0001>

<bundles_post_ra>
// kernel: rsna_forward_pallas.1
= control target key start
LH: loop header
LB: loop body
LE: loop exit
PB: predicated region body
PF: predicated region fallthrough
CT: control target
= control target key end

     0   :  { %s3972_s27 = smov 0   ;;  %s3974_s28 = smov 0   ;;  %s5261_s0 = inlined_call_operand.vmem [shape: bf16[20,3,1280], index: 0, kind: input, shape index: {}, may-alias: {0,1,2}]   ;;  %s5262_s1 = inlined_call_operand.vmem [shape: bf16[20,3,1280], index: 1, kind: input, shape index: {}, may-alias: {0,1,2}]   ;;  %s5263_s2 = inlined_call_operand.vmem [shape: bf16[20,3,1280], index: 2, kind: input, shape index: {}, may-alias: {0,1,2}]   ;;  %s5264_s3 = inlined_call_operand.vmem [shape: bf16[9,32,3], index: 3, kind: input, shape index: {}]   ;;  %s5265_s4 = inlined_call_operand.vmem [shape: f32[32,1], index: 4, kind: input, shape index: {}]   ;;  %s5266_s5 = inlined_call_operand.vmem [shape: f32[32,1], index: 5, kind: input, shape index: {}]   ;;  %s5267_s6 = inlined_call_operand.vmem [shape: f32[32,128], index: 6, kind: input, shape index: {}]   ;;  %s5268_s7 = inlined_call_operand.vmem [shape: f32[1,128], index: 7, kind: input, shape index: {}]   ;;  %s5269_s8 = inlined_call_operand.vmem [shape: f32[2,1,128], index: 8, kind: output, shape index: {}]  }
   0x1   :  { %s3976_s29 = smov 0   ;;  %s3978_s30 = smov 0  }
   0x2   :  { %s3980_s9 = smov 0  }
   0x3 LB: > { %s27_s10 = sadd.s32 1, %s3912_s29  ;;  %s30_s11 = sadd.s32 1, %s3916_s30  ;;  %s3920_s9 = sphi %s3980_s9, %s18_s9   ;;  %s3916_s30 = sphi %s3978_s30, %s5327_s30   ;;  %s3912_s29 = sphi %s3976_s29, %s5326_s29   ;;  %s3908_s28 = sphi %s3974_s28, %s5325_s28   ;;  %s3904_s27 = sphi %s3972_s27, %s5324_s27  }
   0x4   : > { %p28_p0 = scmp.ge.s32.totalorder %s27_s10, 8  ;;  %p3647_p1 = scmp.ge.s32.totalorder %s3920_s9, 1 }
   0x5   : > { %p326_p2 = scmp.lt.s32.totalorder %s3920_s9, 17 }
   0x6   : > { %s5329_s10 = smov (%p28_p0, %s27_s10), 0  ;;  %s5331_s11 = smov (!%p28_p0, %s30_s11), %s3916_s30 }
   0x7   : > { %p327_p3 = pnand %p3647_p1, %p326_p2  ;;  %p32_p4 = scmp.ge.s32.totalorder %s5331_s11, 2 }
   0x9   : > { %s5333_s11 = smov (%p32_p4, %s5331_s11), 0  ;;  %330 = sbr.rel (%p327_p3) target bundleno = 1159 (0x487), region = 52 }
   0xe   : > { %s376_s12 = smul.u32 10, %s3908_s28  ;;  %p407_p8 = scmp.lt.s32.totalorder %s3908_s28, 1 }
   0xf   : > { %p3651_p9 = scmp.ne.s32.totalorder %s3904_s27, 0 }
  0x10   : > { %s377_s13 = sadd.s32 %s3904_s27, %s376_s12  ;;  %s5341_s28 = smov (!%p407_p8, %s3908_s28), 1 }
  0x11   : > { %p378_p5 = scmp.lt.s32.totalorder %s377_s13, 19  ;;  %s387_s14 = sadd.s32 1, %s377_s13 }
  0x12   : > { %p388_p6 = scmp.lt.s32.totalorder %s387_s14, 19  ;;  %s398_s15 = sadd.s32 2, %s377_s13 }
  0x13   : > { %s5335_s13 = smov (!%p378_p5, %s377_s13), 19  ;;  %p399_p7 = scmp.lt.s32.totalorder %s398_s15, 19 }
  0x14   : > { %s5337_s14 = smov (!%p388_p6, %s387_s14), 19  ;;  %s3778_s16 = smul.u32 20, %s5335_s13 }
  0x15   : > { %s3779_s17 = smul.u32 20, %s5337_s14  ;;  %s5339_s15 = smov (!%p399_p7, %s398_s15), 19 }
  0x16   : > { %s4012_s20 = scalar_lea.vmem %s5261_s0, %s3778_s16  ;;  %s3780_s24 = smul.u32 20, %s5339_s15 }
  0x17   : > { %s4017_s23 = scalar_lea.vmem %s5262_s1, %s3779_s17  ;;  %s409_s12 = scalar_lea.vmem %s5269_s8, %s5341_s28 }
  0x18   : > { %s4029_s18 = scalar_lea.vmem %s5263_s2, %s3780_s24  ;;  %414 = sbr.rel (%p3651_p9) target bundleno = 32 (0x20), region = 56 }
  0x1d   : > { %vm415_vm0 = vcmask 7168   ;;  %v3922_v0 = vmov 0.0  }
  0x1e   : > { %416 = vst.msk [vmem:[#allocation2] sm:$0xff] %vm415_vm0, %v3922_v0  ;;  %417 = vst.msk [vmem:[#allocation2 + $0x8] sm:$0xff] %vm415_vm0, %v3922_v0 }
  0x1f   : > { %418 = vst.msk [vmem:[#allocation2 + $0x10] sm:$0xff] %vm415_vm0, %v3922_v0  ;;  %419 = vst.msk [vmem:[#allocation2 + $0x18] sm:$0xff] %vm415_vm0, %v3922_v0 }
  0x20 PF: > { %v426_v1 = vld [vmem:[%s4012_s20 + $0x2] sm:$0xff]  ;;  %v5270_v2 = vlaneseq  ;;  %vm486_vm1 = vcmask 1040384   ;;  %v3923_v3 = vmov 1983009808   ;;  %vm487_vm2 = vcmask 1041408   ;;  %v427_v7 = vld [vmem:[%s4012_s20 + $0xa] sm:$0xff] }
  0x21   : > { %v447_v4 = vunpack.c.l.s4 %v3923_v3  ;;  %v3924_v6 = vmov 0   ;;  %v3925_v9 = vmov 65535   ;;  %v445_v11 = vcombine.high %v426_v1, %v426_v1  ;;  %v420_v13 = vld [vmem:[%s4012_s20] sm:$0xff]  ;;  %v3829_v31 = vld [vmem:[%s5264_s3 + $0x10] sm:$0xff]   ;;  %v421_v40 = vld [vmem:[%s4012_s20 + $0x8] sm:$0xff]  ;;  %p3774_p10 = scmp.ne.s32.totalorder %s3904_s27, 7 }
  0x22   : > { %v450_v5 = vshrl.u32 %v5270_v2, 7  ;;  %546 = vmatprep.mubr.bf16.mxu0 %v3924_v6  ;;  %599 = vmatprep.mubr.bf16.mxu1 %v3924_v6  ;;  %v488_v10 = vsel %vm486_vm1, 4294967295, %v3925_v9  ;;  %v462_v12 = vcombine.high %v427_v7, %v427_v7  ;;  %v738_v14 = vcombine.high %v420_v13, %v420_v13  ;;  %v3831_v42 = vld [vmem:[%s5264_s3 + $0x18] sm:$0xff]   ;;  %v1014_v51 = vld [vmem:[%s4012_s20 + $0x4] sm:$0xff]  ;;  %v1015_v62 = vld [vmem:[%s4012_s20 + $0xc] sm:$0xff] }
  0x23   : > { %v448_v8 = vunpack.c.0.s8 %v447_v4  ;;  %3826 = vset.pattern.permute.xlu0 %v3924_v6  ;;  %3827 = vset.pattern.permute.xlu1 %v3924_v6  ;;  %v4043_v16 = vsel %vm487_vm2, %v488_v10, 0  ;;  %vm479_vm3 = vcmask 23552   ;;  %v755_v41 = vcombine.high %v421_v40, %v421_v40  ;;  %v3833_v57 = vld [vmem:[%s5264_s3] sm:$0xff]   ;;  %v3835_v0 = vld [vmem:[%s5264_s3 + $0x8] sm:$0xff]  }
  0x24   : > { %v1033_v52 = vcombine.high %v1014_v51, %v1014_v51  ;;  %v1050_v63 = vcombine.high %v1015_v62, %v1015_v62  ;;  %vm3435_vm4 = vcmask 7168  }
  0x25   : > { %v4041_v15 = vsub.s32 %v448_v8, %v450_v5 }
  0x27   : > { %v452_v17 = vrot.slane %v426_v1, %v4041_v15  ;;  %v459_v18 = vrot.slane %v445_v11, %v4041_v15  ;;  %v469_v19 = vrot.slane %v427_v7, %v4041_v15  ;;  %v476_v20 = vrot.slane %v462_v12, %v4041_v15  ;;  %v1341_v11 = vld [vmem:[%s4017_s23] sm:$0xff] }
  0x28   : > { %v745_v21 = vrot.slane %v420_v13, %v4041_v15  ;;  %v752_v22 = vrot.slane %v738_v14, %v4041_v15  ;;  %v762_v43 = vrot.slane %v421_v40, %v4041_v15  ;;  %v769_v44 = vrot.slane %v755_v41, %v4041_v15  ;;  %v3841_v41 = vld [vmem:[%s5264_s3 + $0x30] sm:$0xff]  }
  0x29   : > { %v460_v23 = vcombine.high %v452_v17, %v452_v17  ;;  %v461_v24 = vcombine.high %v459_v18, %v459_v18  ;;  %v491_v25 = vand.u32 %v4043_v16, %v452_v17  ;;  %v497_v26 = vand.u32 %v4043_v16, %v459_v18 }
  0x2a   : > { %v477_v27 = vcombine.high %v469_v19, %v469_v19  ;;  %v478_v28 = vcombine.high %v476_v20, %v476_v20  ;;  %v753_v34 = vcombine.high %v745_v21, %v745_v21  ;;  %v754_v35 = vcombine.high %v752_v22, %v752_v22 }
  0x2b   : > { %v494_v29 = vand.u32 %v4043_v16, %v460_v23  ;;  %v500_v30 = vand.u32 %v4043_v16, %v461_v24  ;;  %v503_v36 = vand.u32 %v4043_v16, %v469_v19  ;;  %v509_v37 = vand.u32 %v4043_v16, %v476_v20  ;;  %v3837_v19 = vld [vmem:[%s5264_s3 + $0x20] sm:$0xff]   ;;  %v1342_v24 = vld [vmem:[%s4017_s23 + $0x8] sm:$0xff] }
  0x2c   : > { %v506_v32 = vand.u32 %v4043_v16, %v477_v27  ;;  %v512_v33 = vand.u32 %v4043_v16, %v478_v28  ;;  %v782_v38 = vand.u32 %v753_v34, %v4043_v16  ;;  %v788_v39 = vand.u32 %v754_v35, %v4043_v16  ;;  %v1668_v35 = vld [vmem:[%s4017_s23 + $0x2] sm:$0xff] }
  0x2d   : > { %528 = vmatprep.subr.bf16.mxu0 %v494_v29  ;;  %581 = vmatprep.subr.bf16.mxu1 %v500_v30  ;;  %v770_v45 = vcombine.high %v762_v43, %v762_v43  ;;  %v771_v46 = vcombine.high %v769_v44, %v769_v44  ;;  %v779_v47 = vand.u32 %v745_v21, %v4043_v16 }
  0x2e   : > { %529 = vmatpush1.bf16.msra.mxu0 %v491_v25  ;;  %582 = vmatpush1.bf16.msra.mxu1 %v497_v26  ;;  %v785_v48 = vand.u32 %v752_v22, %v4043_v16  ;;  %v1040_v53 = vrot.slane %v1014_v51, %v4041_v15  ;;  %v1047_v54 = vrot.slane %v1033_v52, %v4041_v15  ;;  %v3839_v26 = vld [vmem:[%s5264_s3 + $0x28] sm:$0xff]  }
  0x2f   : > { %634 = vmatprep.subr.bf16.mxu0 %v506_v32  ;;  %687 = vmatprep.subr.bf16.mxu1 %v512_v33  ;;  %v794_v49 = vand.u32 %v770_v45, %v4043_v16  ;;  %v800_v50 = vand.u32 %v771_v46, %v4043_v16  ;;  %v791_v58 = vand.u32 %v762_v43, %v4043_v16  ;;  %v1669_v46 = vld [vmem:[%s4017_s23 + $0xa] sm:$0xff] }
  0x30   : > { %v1048_v55 = vcombine.high %v1040_v53, %v1040_v53  ;;  %v1049_v56 = vcombine.high %v1047_v54, %v1047_v54  ;;  %v797_v59 = vand.u32 %v769_v44, %v4043_v16  ;;  %v1057_v1 = vrot.slane %v1015_v62, %v4041_v15 }
  0x31   : > { %3658 = vmatmul.mubr.msk.bf16.vlgmr.msra.gmra.mxu0 %vm479_vm3, %v3829_v31  ;;  %3660 = vmatmul.mubr.msk.bf16.vlgmr.msra.gmra.mxu1 %vm479_vm3, %v3829_v31  ;;  %v1064_v3 = vrot.slane %v1050_v63, %v4041_v15  ;;  %v1074_v7 = vand.u32 %v1040_v53, %v4043_v16  ;;  %v1080_v8 = vand.u32 %v1047_v54, %v4043_v16  ;;  %v3845_v63 = vld [vmem:[%s5264_s3 + $0x40] sm:$0xff]  }
  0x32   : > { %635 = vmatpush1.bf16.msra.mxu0 %v503_v36  ;;  %688 = vmatpush1.bf16.msra.mxu1 %v509_v37  ;;  %v1077_v60 = vand.u32 %v1048_v55, %v4043_v16  ;;  %v1083_v61 = vand.u32 %v1049_v56, %v4043_v16  ;;  %v1065_v4 = vcombine.high %v1057_v1, %v1057_v1 }
  0x33   : > { %556 = vmatprep.mubr.bf16.mxu0 %v3924_v6  ;;  %609 = vmatprep.mubr.bf16.mxu1 %v3924_v6  ;;  %v1066_v5 = vcombine.high %v1064_v3, %v1064_v3  ;;  %v1360_v12 = vcombine.high %v1341_v11, %v1341_v11  ;;  %v1367_v13 = vrot.slane %v1341_v11, %v4041_v15 }
  0x34   : > { %816 = vmatprep.subr.bf16.mxu0 %v782_v38  ;;  %869 = vmatprep.subr.bf16.mxu1 %v788_v39  ;;  %v1089_v9 = vand.u32 %v1065_v4, %v4043_v16  ;;  %v1086_v20 = vand.u32 %v1057_v1, %v4043_v16  ;;  %v1092_v21 = vand.u32 %v1064_v3, %v4043_v16 }
  0x35   : > { %v1095_v10 = vand.u32 %v1066_v5, %v4043_v16  ;;  %v1374_v14 = vrot.slane %v1360_v12, %v4041_v15  ;;  %v1375_v17 = vcombine.high %v1367_v13, %v1367_v13  ;;  %v1377_v25 = vcombine.high %v1342_v24, %v1342_v24  ;;  %v1996_v5 = vld [vmem:[%s4017_s23 + $0xc] sm:$0xff] }
  0x36   : > { %v1384_v27 = vrot.slane %v1342_v24, %v4041_v15  ;;  %v1687_v36 = vcombine.high %v1668_v35, %v1668_v35  ;;  %v1694_v37 = vrot.slane %v1668_v35, %v4041_v15 }
  0x37   : > { %v1376_v18 = vcombine.high %v1374_v14, %v1374_v14  ;;  %v1404_v22 = vand.u32 %v1375_v17, %v4043_v16  ;;  %v1391_v28 = vrot.slane %v1377_v25, %v4041_v15  ;;  %v1407_v32 = vand.u32 %v1374_v14, %v4043_v16  ;;  %v3849_v25 = vld [vmem:[%s5264_s3 + $0x50] sm:$0xff]  }
  0x38   : > { %v1392_v29 = vcombine.high %v1384_v27, %v1384_v27  ;;  %v1701_v38 = vrot.slane %v1687_v36, %v4041_v15  ;;  %v1702_v39 = vcombine.high %v1694_v37, %v1694_v37  ;;  %v1728_v53 = vand.u32 %v1694_v37, %v4043_v16 }
  0x39   : > { %3659 = vmatmul.mubr.msk.bf16.gmra.mxu0 %vm479_vm3, %v3831_v42  ;;  %3661 = vmatmul.mubr.msk.bf16.gmra.mxu1 %vm479_vm3, %v3831_v42  ;;  %v1410_v23 = vand.u32 %v1376_v18, %v4043_v16  ;;  %v1393_v30 = vcombine.high %v1391_v28, %v1391_v28  ;;  %v1419_v43 = vand.u32 %v1391_v28, %v4043_v16 }
  0x3a   : > { %652 = vmatprep.mubr.bf16.mxu0 %v3924_v6  ;;  %705 = vmatprep.mubr.bf16.mxu1 %v3924_v6  ;;  %v1416_v33 = vand.u32 %v1392_v29, %v4043_v16  ;;  %v1703_v40 = vcombine.high %v1701_v38, %v1701_v38  ;;  %v1731_v44 = vand.u32 %v1702_v39, %v4043_v16 }
  0x3b   : > { %v1422_v34 = vand.u32 %v1393_v30, %v4043_v16  ;;  %v1734_v54 = vand.u32 %v1701_v38, %v4043_v16  ;;  %v2323_v30 = vld [vmem:[%s4029_s18 + $0x8] sm:$0xff] }
  0x3c   : > { %v1737_v45 = vand.u32 %v1703_v40, %v4043_v16 }
  0x41   : > { %3662 = vmatmul.mubr.msk.bf16.vlgmr.msra.gmra.mxu0 %vm479_vm3, %v3829_v31  ;;  %3664 = vmatmul.mubr.msk.bf16.vlgmr.msra.gmra.mxu1 %vm479_vm3, %v3829_v31  ;;  %v1401_v31 = vand.u32 %v1367_v13, %v4043_v16 }
  0x42   : > { %817 = vmatpush1.bf16.msra.mxu0 %v779_v47  ;;  %870 = vmatpush1.bf16.msra.mxu1 %v785_v48  ;;  %v1704_v47 = vcombine.high %v1669_v46, %v1669_v46  ;;  %v3843_v48 = vld [vmem:[%s5264_s3 + $0x38] sm:$0xff]  }
  0x43   : > { %662 = vmatprep.mubr.bf16.mxu0 %v3924_v6  ;;  %715 = vmatprep.mubr.bf16.mxu1 %v3924_v6 }
  0x44   : > { %922 = vmatprep.subr.bf16.mxu0 %v794_v49  ;;  %975 = vmatprep.subr.bf16.mxu1 %v800_v50  ;;  %v1711_v49 = vrot.slane %v1669_v46, %v4041_v15  ;;  %v1718_v50 = vrot.slane %v1704_v47, %v4041_v15  ;;  %v3853_v47 = vld [vmem:[%s5264_s3 + $0x60] sm:$0xff]  }
  0x46   : > { %v1719_v51 = vcombine.high %v1711_v49, %v1711_v49  ;;  %v1720_v52 = vcombine.high %v1718_v50, %v1718_v50  ;;  %v1746_v1 = vand.u32 %v1718_v50, %v4043_v16 }
  0x48   : > { %v1743_v55 = vand.u32 %v1719_v51, %v4043_v16  ;;  %v1749_v56 = vand.u32 %v1720_v52, %v4043_v16 }
  0x49   : > { %3663 = vmatmul.mubr.msk.bf16.gmra.mxu0 %vm479_vm3, %v3831_v42  ;;  %3665 = vmatmul.mubr.msk.bf16.gmra.mxu1 %vm479_vm3, %v3831_v42  ;;  %v1413_v42 = vand.u32 %v1384_v27, %v4043_v16 }
  0x4a   : > { %834 = vmatprep.mubr.bf16.mxu0 %v3924_v6  ;;  %887 = vmatprep.mubr.bf16.mxu1 %v3924_v6 }
  0x51   : > { %3668 = vmatmul.mubr.msk.bf16.vlgmr.msra.gmra.mxu0 %vm479_vm3, %v3833_v57  ;;  %3670 = vmatmul.mubr.msk.bf16.vlgmr.msra.gmra.mxu1 %vm479_vm3, %v3833_v57 }
  0x52   : > { %923 = vmatpush1.bf16.msra.mxu0 %v791_v58  ;;  %976 = vmatpush1.bf16.msra.mxu1 %v797_v59 }
  0x53   : > { %844 = vmatprep.mubr.bf16.mxu0 %v3924_v6  ;;  %897 = vmatprep.mubr.bf16.mxu1 %v3924_v6 }
  0x54   : > { %1111 = vmatprep.subr.bf16.mxu0 %v1077_v60  ;;  %1164 = vmatprep.subr.bf16.mxu1 %v1083_v61 }
  0x59   : > { %3669 = vmatmul.mubr.msk.bf16.gmra.mxu0 %vm479_vm3, %v3835_v0  ;;  %3671 = vmatmul.mubr.msk.bf16.gmra.mxu1 %vm479_vm3, %v3835_v0 }
  0x5a   : > { %940 = vmatprep.mubr.bf16.mxu0 %v3924_v6  ;;  %993 = vmatprep.mubr.bf16.mxu1 %v3924_v6 }
  0x61   : > { %3672 = vmatmul.mubr.msk.bf16.vlgmr.msra.gmra.mxu0 %vm479_vm3, %v3833_v57  ;;  %3674 = vmatmul.mubr.msk.bf16.vlgmr.msra.gmra.mxu1 %vm479_vm3, %v3833_v57  ;;  %v1995_v57 = vld [vmem:[%s4017_s23 + $0x4] sm:$0xff] }
  0x62   : > { %1112 = vmatpush1.bf16.msra.mxu0 %v1074_v7  ;;  %1165 = vmatpush1.bf16.msra.mxu1 %v1080_v8  ;;  %v2014_v58 = vcombine.high %v1995_v57, %v1995_v57  ;;  %v2021_v59 = vrot.slane %v1995_v57, %v4041_v15  ;;  %v2031_v7 = vcombine.high %v1996_v5, %v1996_v5  ;;  %v3847_v8 = vld [vmem:[%s5264_s3 + $0x48] sm:$0xff]  }
  0x63   : > { %950 = vmatprep.mubr.bf16.mxu0 %v3924_v6  ;;  %1003 = vmatprep.mubr.bf16.mxu1 %v3924_v6 }
  0x64   : > { %1217 = vmatprep.subr.bf16.mxu0 %v1089_v9  ;;  %1270 = vmatprep.subr.bf16.mxu1 %v1095_v10  ;;  %v2028_v60 = vrot.slane %v2014_v58, %v4041_v15  ;;  %v2029_v61 = vcombine.high %v2021_v59, %v2021_v59  ;;  %v2038_v9 = vrot.slane %v1996_v5, %v4041_v15 }
  0x65   : > { %v2045_v10 = vrot.slane %v2031_v7, %v4041_v15  ;;  %v2055_v13 = vand.u32 %v2021_v59, %v4043_v16 }
  0x66   : > { %v2030_v62 = vcombine.high %v2028_v60, %v2028_v60  ;;  %v2058_v3 = vand.u32 %v2029_v61, %v4043_v16  ;;  %v2046_v11 = vcombine.high %v2038_v9, %v2038_v9  ;;  %v2061_v14 = vand.u32 %v2028_v60, %v4043_v16  ;;  %v3855_v60 = vld [vmem:[%s5264_s3 + $0x68] sm:$0xff]  }
  0x67   : > { %v2047_v12 = vcombine.high %v2045_v10, %v2045_v10  ;;  %v2073_v27 = vand.u32 %v2045_v10, %v4043_v16 }
  0x68   : > { %v2064_v4 = vand.u32 %v2030_v62, %v4043_v16  ;;  %v2070_v17 = vand.u32 %v2046_v11, %v4043_v16 }
  0x69   : > { %3673 = vmatmul.mubr.msk.bf16.gmra.mxu0 %vm479_vm3, %v3835_v0  ;;  %3675 = vmatmul.mubr.msk.bf16.gmra.mxu1 %vm479_vm3, %v3835_v0  ;;  %v1740_v0 = vand.u32 %v1711_v49, %v4043_v16  ;;  %v2076_v18 = vand.u32 %v2047_v12, %v4043_v16 }
  0x6a   : > { %1129 = vmatprep.mubr.bf16.mxu0 %v3924_v6  ;;  %1182 = vmatprep.mubr.bf16.mxu1 %v3924_v6 }
  0x71   : > { %3682 = vmatmul.mubr.msk.bf16.vlgmr.msra.gmra.mxu0 %vm479_vm3, %v3837_v19  ;;  %3684 = vmatmul.mubr.msk.bf16.vlgmr.msra.gmra.mxu1 %vm479_vm3, %v3837_v19 }
  0x72   : > { %1218 = vmatpush1.bf16.msra.mxu0 %v1086_v20  ;;  %1271 = vmatpush1.bf16.msra.mxu1 %v1092_v21 }
  0x73   : > { %1139 = vmatprep.mubr.bf16.mxu0 %v3924_v6  ;;  %1192 = vmatprep.mubr.bf16.mxu1 %v3924_v6 }
  0x74   : > { %1438 = vmatprep.subr.bf16.mxu0 %v1404_v22  ;;  %1491 = vmatprep.subr.bf16.mxu1 %v1410_v23 }
  0x79   : > { %3683 = vmatmul.mubr.msk.bf16.gmra.mxu0 %vm479_vm3, %v3839_v26  ;;  %3685 = vmatmul.mubr.msk.bf16.gmra.mxu1 %vm479_vm3, %v3839_v26 }
  0x7a   : > { %1235 = vmatprep.mubr.bf16.mxu0 %v3924_v6  ;;  %1288 = vmatprep.mubr.bf16.mxu1 %v3924_v6 }
  0x81   : > { %3686 = vmatmul.mubr.msk.bf16.vlgmr.msra.gmra.mxu0 %vm479_vm3, %v3837_v19  ;;  %3688 = vmatmul.mubr.msk.bf16.vlgmr.msra.gmra.mxu1 %vm479_vm3, %v3837_v19  ;;  %v2322_v19 = vld [vmem:[%s4029_s18] sm:$0xff] }
  0x82   : > { %1439 = vmatpush1.bf16.msra.mxu0 %v1401_v31  ;;  %1492 = vmatpush1.bf16.msra.mxu1 %v1407_v32  ;;  %v2341_v20 = vcombine.high %v2322_v19, %v2322_v19  ;;  %v2348_v21 = vrot.slane %v2322_v19, %v4041_v15  ;;  %v2358_v31 = vcombine.high %v2323_v30, %v2323_v30  ;;  %v3851_v32 = vld [vmem:[%s5264_s3 + $0x58] sm:$0xff]   ;;  %v3305_v19 = vld [vmem:[%s5265_s4 + $0x10] sm:$0xff] }
  0x83   : > { %1245 = vmatprep.mubr.bf16.mxu0 %v3924_v6  ;;  %1298 = vmatprep.mubr.bf16.mxu1 %v3924_v6 }
  0x84   : > { %1544 = vmatprep.subr.bf16.mxu0 %v1416_v33  ;;  %1597 = vmatprep.subr.bf16.mxu1 %v1422_v34  ;;  %v2355_v22 = vrot.slane %v2341_v20, %v4041_v15  ;;  %v2356_v23 = vcombine.high %v2348_v21, %v2348_v21  ;;  %v2365_v33 = vrot.slane %v2323_v30, %v4041_v15 }
  0x85   : > { %v2372_v34 = vrot.slane %v2358_v31, %v4041_v15  ;;  %v2382_v37 = vand.u32 %v2348_v21, %v4043_v16  ;;  %3319 = vperm.xlu1 %3827, %v3305_v19  }
  0x86   : > { %v2357_v24 = vcombine.high %v2355_v22, %v2355_v22  ;;  %v2385_v28 = vand.u32 %v2356_v23, %v4043_v16  ;;  %v2373_v35 = vcombine.high %v2365_v33, %v2365_v33  ;;  %v2388_v38 = vand.u32 %v2355_v22, %v4043_v16 }
  0x87   : > { %v2374_v36 = vcombine.high %v2372_v34, %v2372_v34  ;;  %v2400_v49 = vand.u32 %v2372_v34, %v4043_v16 }
  0x88   : > { %v2391_v29 = vand.u32 %v2357_v24, %v4043_v16  ;;  %v2397_v39 = vand.u32 %v2373_v35, %v4043_v16  ;;  %v2976_v24 = vld [vmem:[%s4029_s18 + $0x4] sm:$0xff] }
  0x89   : > { %3687 = vmatmul.mubr.msk.bf16.gmra.mxu0 %vm479_vm3, %v3839_v26  ;;  %3689 = vmatmul.mubr.msk.bf16.gmra.mxu1 %vm479_vm3, %v3839_v26  ;;  %v2067_v26 = vand.u32 %v2038_v9, %v4043_v16  ;;  %v2403_v40 = vand.u32 %v2374_v36, %v4043_v16 }
  0x8a   : > { %1456 = vmatprep.mubr.bf16.mxu0 %v3924_v6  ;;  %1509 = vmatprep.mubr.bf16.mxu1 %v3924_v6 }
  0x91   : > { %3696 = vmatmul.mubr.msk.bf16.vlgmr.msra.gmra.mxu0 %vm479_vm3, %v3841_v41  ;;  %3698 = vmatmul.mubr.msk.bf16.vlgmr.msra.gmra.mxu1 %vm479_vm3, %v3841_v41 }
  0x92   : > { %1545 = vmatpush1.bf16.msra.mxu0 %v1413_v42  ;;  %1598 = vmatpush1.bf16.msra.mxu1 %v1419_v43 }
  0x93   : > { %1466 = vmatprep.mubr.bf16.mxu0 %v3924_v6  ;;  %1519 = vmatprep.mubr.bf16.mxu1 %v3924_v6 }
  0x94   : > { %1765 = vmatprep.subr.bf16.mxu0 %v1731_v44  ;;  %1818 = vmatprep.subr.bf16.mxu1 %v1737_v45 }
  0x99   : > { %3697 = vmatmul.mubr.msk.bf16.gmra.mxu0 %vm479_vm3, %v3843_v48  ;;  %3699 = vmatmul.mubr.msk.bf16.gmra.mxu1 %vm479_vm3, %v3843_v48 }
  0x9a   : > { %1562 = vmatprep.mubr.bf16.mxu0 %v3924_v6  ;;  %1615 = vmatprep.mubr.bf16.mxu1 %v3924_v6 }
  0xa1   : > { %3700 = vmatmul.mubr.msk.bf16.vlgmr.msra.gmra.mxu0 %vm479_vm3, %v3841_v41  ;;  %3702 = vmatmul.mubr.msk.bf16.vlgmr.msra.gmra.mxu1 %vm479_vm3, %v3841_v41  ;;  %v2649_v41 = vld [vmem:[%s4029_s18 + $0x2] sm:$0xff] }
  0xa2   : > { %1766 = vmatpush1.bf16.msra.mxu0 %v1728_v53  ;;  %1819 = vmatpush1.bf16.msra.mxu1 %v1734_v54  ;;  %v2668_v42 = vcombine.high %v2649_v41, %v2649_v41  ;;  %v4268_v43 = vrot.slane %v2649_v41, %v4041_v15  ;;  %v2650_v54 = vld [vmem:[%s4029_s18 + $0xa] sm:$0xff] }
  0xa3   : > { %1572 = vmatprep.mubr.bf16.mxu0 %v3924_v6  ;;  %1625 = vmatprep.mubr.bf16.mxu1 %v3924_v6  ;;  %v2685_v57 = vcombine.high %v2650_v54, %v2650_v54 }
  0xa4   : > { %1871 = vmatprep.subr.bf16.mxu0 %v1743_v55  ;;  %1924 = vmatprep.subr.bf16.mxu1 %v1749_v56  ;;  %v4271_v44 = vrot.slane %v2668_v42, %v4041_v15  ;;  %v2683_v45 = vcombine.high %v4268_v43, %v4268_v43 }
  0xa6   : > { %v2684_v46 = vcombine.high %v4271_v44, %v4271_v44  ;;  %v2712_v50 = vand.u32 %v2683_v45, %v4043_v16 }
  0xa8   : > { %v2718_v51 = vand.u32 %v2684_v46, %v4043_v16 }
  0xa9   : > { %3701 = vmatmul.mubr.msk.bf16.gmra.mxu0 %vm479_vm3, %v3843_v48  ;;  %3703 = vmatmul.mubr.msk.bf16.gmra.mxu1 %vm479_vm3, %v3843_v48  ;;  %v2394_v48 = vand.u32 %v2365_v33, %v4043_v16  ;;  %v4382_v33 = vrot.slane %v2976_v24, %v4041_v15 }
  0xaa   : > { %1783 = vmatprep.mubr.bf16.mxu0 %v3924_v6  ;;  %1836 = vmatprep.mubr.bf16.mxu1 %v3924_v6 }
  0xb1   : > { %3710 = vmatmul.mubr.msk.bf16.vlgmr.msra.gmra.mxu0 %vm479_vm3, %v3845_v63  ;;  %3712 = vmatmul.mubr.msk.bf16.vlgmr.msra.gmra.mxu1 %vm479_vm3, %v3845_v63 }
  0xb2   : > { %1872 = vmatpush1.bf16.msra.mxu0 %v1740_v0  ;;  %1925 = vmatpush1.bf16.msra.mxu1 %v1746_v1  ;;  %v4316_v0 = vrot.slane %v2650_v54, %v4041_v15  ;;  %v4319_v1 = vrot.slane %v2685_v57, %v4041_v15  ;;  %v2977_v54 = vld [vmem:[%s4029_s18 + $0xc] sm:$0xff] }
  0xb3   : > { %1793 = vmatprep.mubr.bf16.mxu0 %v3924_v6  ;;  %1846 = vmatprep.mubr.bf16.mxu1 %v3924_v6 }
  0xb4   : > { %2092 = vmatprep.subr.bf16.mxu0 %v2058_v3  ;;  %2145 = vmatprep.subr.bf16.mxu1 %v2064_v4  ;;  %v2700_v9 = vcombine.high %v4316_v0, %v4316_v0  ;;  %v2701_v10 = vcombine.high %v4319_v1, %v4319_v1  ;;  %v2727_v45 = vand.u32 %v4319_v1, %v4043_v16 }
  0xb6   : > { %v2724_v20 = vand.u32 %v2700_v9, %v4043_v16  ;;  %v2730_v21 = vand.u32 %v2701_v10, %v4043_v16  ;;  %v3859_v10 = vld [vmem:[%s5264_s3 + $0x78] sm:$0xff]  }
  0xb9   : > { %3711 = vmatmul.mubr.msk.bf16.gmra.mxu0 %vm479_vm3, %v3847_v8  ;;  %3713 = vmatmul.mubr.msk.bf16.gmra.mxu1 %vm479_vm3, %v3847_v8 }
  0xba   : > { %1889 = vmatprep.mubr.bf16.mxu0 %v3924_v6  ;;  %1942 = vmatprep.mubr.bf16.mxu1 %v3924_v6 }
  0xc1   : > { %3714 = vmatmul.mubr.msk.bf16.vlgmr.msra.gmra.mxu0 %vm479_vm3, %v3845_v63  ;;  %3716 = vmatmul.mubr.msk.bf16.vlgmr.msra.gmra.mxu1 %vm479_vm3, %v3845_v63  ;;  %v3303_v63 = vld [vmem:[%s5265_s4] sm:$0xff] }
  0xc2   : > { %2093 = vmatpush1.bf16.msra.mxu0 %v2055_v13  ;;  %2146 = vmatpush1.bf16.msra.mxu1 %v2061_v14  ;;  %v2709_v13 = vand.u32 %v4268_v43, %v4043_v16  ;;  %v2715_v14 = vand.u32 %v4271_v44, %v4043_v16  ;;  %v4410_v43 = vld [vmem:[%s5264_s3 + $0x70] sm:$0xff]   ;;  %v2721_v44 = vand.u32 %v4316_v0, %v4043_v16 }
  0xc3   : > { %1899 = vmatprep.mubr.bf16.mxu0 %v3924_v6  ;;  %1952 = vmatprep.mubr.bf16.mxu1 %v3924_v6 }
  0xc4   : > { %2198 = vmatprep.subr.bf16.mxu0 %v2070_v17  ;;  %2251 = vmatprep.subr.bf16.mxu1 %v2076_v18 }
  0xc5   : > { %3309 = vperm.xlu0 %3826, %v3303_v63  }
  0xc9   : > { %3715 = vmatmul.mubr.msk.bf16.gmra.mxu0 %vm479_vm3, %v3847_v8  ;;  %3717 = vmatmul.mubr.msk.bf16.gmra.mxu1 %vm479_vm3, %v3847_v8  ;;  %v3304_v8 = vld [vmem:[%s5265_s4 + $0x8] sm:$0xff] }
  0xca   : > { %2110 = vmatprep.mubr.bf16.mxu0 %v3924_v6  ;;  %2163 = vmatprep.mubr.bf16.mxu1 %v3924_v6 }
  0xcb   : > { %3314 = vperm.xlu0 %3826, %v3304_v8  }
  0xd1   : > { %3724 = vmatmul.mubr.msk.bf16.vlgmr.msra.gmra.mxu0 %vm479_vm3, %v3849_v25  ;;  %3726 = vmatmul.mubr.msk.bf16.vlgmr.msra.gmra.mxu1 %vm479_vm3, %v3849_v25 }
  0xd2   : > { %2199 = vmatpush1.bf16.msra.mxu0 %v2067_v26  ;;  %2252 = vmatpush1.bf16.msra.mxu1 %v2073_v27  ;;  %v3306_v27 = vld [vmem:[%s5265_s4 + $0x18] sm:$0xff] }
  0xd3   : > { %2120 = vmatprep.mubr.bf16.mxu0 %v3924_v6  ;;  %2173 = vmatprep.mubr.bf16.mxu1 %v3924_v6 }
  0xd4   : > { %2419 = vmatprep.subr.bf16.mxu0 %v2385_v28  ;;  %2472 = vmatprep.subr.bf16.mxu1 %v2391_v29  ;;  %v2995_v28 = vcombine.high %v2976_v24, %v2976_v24 }
  0xd5   : > { %3324 = vperm.xlu1 %3827, %v3306_v27  }
  0xd6   : > { %v4385_v34 = vrot.slane %v2995_v28, %v4041_v15 }
  0xd9   : > { %3725 = vmatmul.mubr.msk.bf16.gmra.mxu0 %vm479_vm3, %v3851_v32  ;;  %3727 = vmatmul.mubr.msk.bf16.gmra.mxu1 %vm479_vm3, %v3851_v32 }
  0xda   : > { %2216 = vmatprep.mubr.bf16.mxu0 %v3924_v6  ;;  %2269 = vmatprep.mubr.bf16.mxu1 %v3924_v6 }
  0xe1   : > { %3728 = vmatmul.mubr.msk.bf16.vlgmr.msra.gmra.mxu0 %vm479_vm3, %v3849_v25  ;;  %3730 = vmatmul.mubr.msk.bf16.vlgmr.msra.gmra.mxu1 %vm479_vm3, %v3849_v25 }
  0xe2   : > { %2420 = vmatpush1.bf16.msra.mxu0 %v2382_v37  ;;  %2473 = vmatpush1.bf16.msra.mxu1 %v2388_v38 }
  0xe3   : > { %2226 = vmatprep.mubr.bf16.mxu0 %v3924_v6  ;;  %2279 = vmatprep.mubr.bf16.mxu1 %v3924_v6 }
  0xe4   : > { %2525 = vmatprep.subr.bf16.mxu0 %v2397_v39  ;;  %2578 = vmatprep.subr.bf16.mxu1 %v2403_v40  ;;  %v3010_v39 = vcombine.high %v4382_v33, %v4382_v33  ;;  %v3011_v40 = vcombine.high %v4385_v34, %v4385_v34 }
  0xe9   : > { %3729 = vmatmul.mubr.msk.bf16.gmra.mxu0 %vm479_vm3, %v3851_v32  ;;  %3731 = vmatmul.mubr.msk.bf16.gmra.mxu1 %vm479_vm3, %v3851_v32 }
  0xea   : > { %2437 = vmatprep.mubr.bf16.mxu0 %v3924_v6  ;;  %2490 = vmatprep.mubr.bf16.mxu1 %v3924_v6 }
  0xf1   : > { %v4288_v52 = vpop.f32.mrf.mxu0  ;;  %v4290_v53 = vpop.f32.mrf.mxu1  ;;  %3738 = vmatmul.mubr.msk.bf16.vlgmr.msra.gmra.mxu0 %vm479_vm3, %v3853_v47  ;;  %3740 = vmatmul.mubr.msk.bf16.vlgmr.msra.gmra.mxu1 %vm479_vm3, %v3853_v47 }
  0xf2   : > { %2526 = vmatpush1.bf16.msra.mxu0 %v2394_v48  ;;  %2579 = vmatpush1.bf16.msra.mxu1 %v2400_v49  ;;  %v3039_v48 = vand.u32 %v3010_v39, %v4043_v16  ;;  %v3045_v49 = vand.u32 %v3011_v40, %v4043_v16 }
  0xf3   : > { %v4295_v55 = vpop.f32.mrf.mxu0  ;;  %v4297_v56 = vpop.f32.mrf.mxu1  ;;  %2447 = vmatprep.mubr.bf16.mxu0 %v3924_v6  ;;  %2500 = vmatprep.mubr.bf16.mxu1 %v3924_v6 }
  0xf4   : > { %2746 = vmatprep.subr.bf16.mxu0 %v2712_v50  ;;  %2799 = vmatprep.subr.bf16.mxu1 %v2718_v51 }
  0xf5   : > { %v4301_v58 = vpop.f32.mrf.mxu0  ;;  %v4303_v59 = vpop.f32.mrf.mxu1 }
  0xf7   : > { %v4308_v61 = vpop.f32.mrf.mxu0  ;;  %v4310_v62 = vpop.f32.mrf.mxu1 }
  0xf9   : > { %v4321_v3 = vpop.f32.mrf.mxu0  ;;  %v4323_v4 = vpop.f32.mrf.mxu1  ;;  %3739 = vmatmul.mubr.msk.bf16.gmra.mxu0 %vm479_vm3, %v3855_v60  ;;  %3741 = vmatmul.mubr.msk.bf16.gmra.mxu1 %vm479_vm3, %v3855_v60 }
  0xfa   : > { %2543 = vmatprep.mubr.bf16.mxu0 %v3924_v6  ;;  %2596 = vmatprep.mubr.bf16.mxu1 %v3924_v6 }
  0xfb   : > { %v4329_v5 = vpop.f32.mrf.mxu0  ;;  %v4331_v7 = vpop.f32.mrf.mxu1 }
  0xfd   : > { %v4340_v11 = vpop.f32.mrf.mxu0  ;;  %v4342_v12 = vpop.f32.mrf.mxu1 }
  0xff   : > { %v4348_v17 = vpop.f32.mrf.mxu0  ;;  %v4350_v18 = vpop.f32.mrf.mxu1 }
 0x101   : > { %v4357_v22 = vpop.f32.mrf.mxu0  ;;  %v4359_v23 = vpop.f32.mrf.mxu1  ;;  %3742 = vmatmul.mubr.msk.bf16.vlgmr.msra.gmra.mxu0 %vm479_vm3, %v3853_v47  ;;  %3744 = vmatmul.mubr.msk.bf16.vlgmr.msra.gmra.mxu1 %vm479_vm3, %v3853_v47 }
 0x102   : > { %2747 = vmatpush1.bf16.msra.mxu0 %v2709_v13  ;;  %2800 = vmatpush1.bf16.msra.mxu1 %v2715_v14 }
 0x103   : > { %v4364_v25 = vpop.f32.mrf.mxu0  ;;  %v4366_v26 = vpop.f32.mrf.mxu1  ;;  %2553 = vmatprep.mubr.bf16.mxu0 %v3924_v6  ;;  %2606 = vmatprep.mubr.bf16.mxu1 %v3924_v6 }
 0x104   : > { %2852 = vmatprep.subr.bf16.mxu0 %v2724_v20  ;;  %2905 = vmatprep.subr.bf16.mxu1 %v2730_v21  ;;  %v4457_v21 = vrot.slane %v2977_v54, %v4041_v15 }
 0x105   : > { %v4373_v29 = vpop.f32.mrf.mxu0  ;;  %v4375_v30 = vpop.f32.mrf.mxu1 }
 0x106   : > { %v3027_v40 = vcombine.high %v4457_v21, %v4457_v21 }
 0x107   : > { %v4377_v31 = vpop.f32.mrf.mxu0  ;;  %v4379_v32 = vpop.f32.mrf.mxu1 }
 0x109   : > { %v4387_v35 = vpop.f32.mrf.mxu0  ;;  %v4389_v36 = vpop.f32.mrf.mxu1  ;;  %3743 = vmatmul.mubr.msk.bf16.gmra.mxu0 %vm479_vm3, %v3855_v60  ;;  %3745 = vmatmul.mubr.msk.bf16.gmra.mxu1 %vm479_vm3, %v3855_v60 }
 0x10a   : > { %2764 = vmatprep.mubr.bf16.mxu0 %v3924_v6  ;;  %2817 = vmatprep.mubr.bf16.mxu1 %v3924_v6 }
 0x10b   : > { %v4395_v37 = vpop.f32.mrf.mxu0  ;;  %v4397_v38 = vpop.f32.mrf.mxu1 }
 0x10d   : > { %v4403_v41 = vpop.f32.mrf.mxu0  ;;  %v4405_v42 = vpop.f32.mrf.mxu1 }
 0x10f   : > { %v4416_v46 = vpop.f32.mrf.mxu0  ;;  %v4418_v47 = vpop.f32.mrf.mxu1 }
 0x111   : > { %v836_v50 = vpop.f32.mrf.mxu0  ;;  %v889_v51 = vpop.f32.mrf.mxu1  ;;  %3752 = vmatmul.mubr.msk.bf16.vlgmr.msra.gmra.mxu0 %vm479_vm3, %v4410_v43  ;;  %3754 = vmatmul.mubr.msk.bf16.vlgmr.msra.gmra.mxu1 %vm479_vm3, %v4410_v43 }
 0x112   : > { %v4428_v57 = vadd.f32 %v836_v50, %v4288_v52  ;;  %v4431_v60 = vadd.f32 %v889_v51, %v4290_v53  ;;  %2853 = vmatpush1.bf16.msra.mxu0 %v2721_v44  ;;  %2906 = vmatpush1.bf16.msra.mxu1 %v2727_v45  ;;  %v3012_v52 = vcombine.high %v2977_v54, %v2977_v54 }
 0x113   : > { %v838_v63 = vpop.f32.mrf.mxu0  ;;  %v891_v0 = vpop.f32.mrf.mxu1  ;;  %2774 = vmatprep.mubr.bf16.mxu0 %v3924_v6  ;;  %2827 = vmatprep.mubr.bf16.mxu1 %v3924_v6 }
 0x114   : > { %v4436_v1 = vadd.f32 %v838_v63, %v4295_v55  ;;  %v4439_v8 = vadd.f32 %v891_v0, %v4297_v56  ;;  %3073 = vmatprep.subr.bf16.mxu0 %v3039_v48  ;;  %3126 = vmatprep.subr.bf16.mxu1 %v3045_v49  ;;  %v4460_v24 = vrot.slane %v3012_v52, %v4041_v15 }
 0x115   : > { %v840_v9 = vpop.f32.mrf.mxu0  ;;  %v893_v53 = vpop.f32.mrf.mxu1 }
 0x116   : > { %v4445_v13 = vadd.f32 %v840_v9, %v4301_v58  ;;  %v4448_v14 = vadd.f32 %v893_v53, %v4303_v59 }
 0x117   : > { %v842_v55 = vpop.f32.mrf.mxu0  ;;  %v895_v19 = vpop.f32.mrf.mxu1 }
 0x118   : > { %v4451_v56 = vadd.f32 %v842_v55, %v4308_v61  ;;  %v4454_v20 = vadd.f32 %v895_v19, %v4310_v62 }
 0x119   : > { %v846_v27 = vpop.f32.mrf.mxu0  ;;  %v899_v58 = vpop.f32.mrf.mxu1  ;;  %3753 = vmatmul.mubr.msk.bf16.gmra.mxu0 %vm479_vm3, %v3859_v10  ;;  %3755 = vmatmul.mubr.msk.bf16.gmra.mxu1 %vm479_vm3, %v3859_v10 }
 0x11a   : > { %v4465_v59 = vadd.f32 %v846_v27, %v4321_v3  ;;  %v4468_v61 = vadd.f32 %v899_v58, %v4323_v4  ;;  %2870 = vmatprep.mubr.bf16.mxu0 %v3924_v6  ;;  %2923 = vmatprep.mubr.bf16.mxu1 %v3924_v6  ;;  %v3028_v3 = vcombine.high %v4460_v24, %v4460_v24 }
 0x11b   : > { %v848_v62 = vpop.f32.mrf.mxu0  ;;  %v901_v28 = vpop.f32.mrf.mxu1 }
 0x11c   : > { %v4473_v15 = vadd.f32 %v848_v62, %v4329_v5  ;;  %v4476_v39 = vadd.f32 %v901_v28, %v4331_v7  ;;  %v3036_v5 = vand.u32 %v4382_v33, %v4043_v16  ;;  %v3042_v7 = vand.u32 %v4385_v34, %v4043_v16 }
 0x11d   : > { %v850_v4 = vpop.f32.mrf.mxu0  ;;  %v903_v44 = vpop.f32.mrf.mxu1  ;;  %v3057_v63 = vand.u32 %v3028_v3, %v4043_v16 }
 0x11e   : > { %v4483_v45 = vadd.f32 %v850_v4, %v4340_v11  ;;  %v4486_v48 = vadd.f32 %v903_v44, %v4342_v12  ;;  %v3051_v11 = vand.u32 %v3027_v40, %v4043_v16  ;;  %v3048_v4 = vand.u32 %v4457_v21, %v4043_v16 }
 0x11f   : > { %v852_v49 = vpop.f32.mrf.mxu0  ;;  %v905_v50 = vpop.f32.mrf.mxu1 }
 0x120   : > { %v4493_v51 = vadd.f32 %v852_v49, %v4348_v17  ;;  %v4496_v54 = vadd.f32 %v905_v50, %v4350_v18 }
 0x121   : > { %v942_v12 = vpop.f32.mrf.mxu0  ;;  %v995_v0 = vpop.f32.mrf.mxu1  ;;  %3756 = vmatmul.mubr.msk.bf16.vlgmr.msra.gmra.mxu0 %vm479_vm3, %v4410_v43  ;;  %3758 = vmatmul.mubr.msk.bf16.vlgmr.msra.gmra.mxu1 %vm479_vm3, %v4410_v43 }
 0x122   : > { %v4505_v33 = vadd.f32 %v942_v12, %v4357_v22  ;;  %v4508_v17 = vadd.f32 %v995_v0, %v4359_v23  ;;  %3074 = vmatpush1.bf16.msra.mxu0 %v3036_v5  ;;  %3127 = vmatpush1.bf16.msra.mxu1 %v3042_v7 }
 0x123   : > { %v944_v18 = vpop.f32.mrf.mxu0  ;;  %v997_v34 = vpop.f32.mrf.mxu1  ;;  %2880 = vmatprep.mubr.bf16.mxu0 %v3924_v6  ;;  %2933 = vmatprep.mubr.bf16.mxu1 %v3924_v6 }
 0x124   : > { %v4513_v52 = vadd.f32 %v944_v18, %v4364_v25  ;;  %v4516_v9 = vadd.f32 %v997_v34, %v4366_v26  ;;  %3179 = vmatprep.subr.bf16.mxu0 %v3051_v11  ;;  %3232 = vmatprep.subr.bf16.mxu1 %v3057_v63 }
 0x125   : > { %v946_v22 = vpop.f32.mrf.mxu0  ;;  %v999_v43 = vpop.f32.mrf.mxu1 }
 0x126   : > { %v4519_v23 = vadd.f32 %v946_v22, %v4373_v29  ;;  %v4522_v53 = vadd.f32 %v999_v43, %v4375_v30 }
 0x127   : > { %v948_v55 = vpop.f32.mrf.mxu0  ;;  %v1001_v19 = vpop.f32.mrf.mxu1 }
 0x128   : > { %v4525_v27 = vadd.f32 %v948_v55, %v4377_v31  ;;  %v4528_v25 = vadd.f32 %v1001_v19, %v4379_v32 }
 0x129   : > { %v952_v26 = vpop.f32.mrf.mxu0  ;;  %v1005_v58 = vpop.f32.mrf.mxu1  ;;  %3757 = vmatmul.mubr.msk.bf16.gmra.mxu0 %vm479_vm3, %v3859_v10  ;;  %3759 = vmatmul.mubr.msk.bf16.gmra.mxu1 %vm479_vm3, %v3859_v10 }
 0x12a   : > { %v4533_v29 = vadd.f32 %v952_v26, %v4387_v35  ;;  %v4536_v30 = vadd.f32 %v1005_v58, %v4389_v36  ;;  %3091 = vmatprep.mubr.bf16.mxu0 %v3924_v6  ;;  %3144 = vmatprep.mubr.bf16.mxu1 %v3924_v6  ;;  %v3861_v35 = vld [vmem:[%s5264_s3 + $0x80] sm:$0xff]  }
 0x12b   : > { %v954_v31 = vpop.f32.mrf.mxu0  ;;  %v1007_v62 = vpop.f32.mrf.mxu1 }
 0x12c   : > { %v4541_v32 = vadd.f32 %v954_v31, %v4395_v37  ;;  %v4544_v28 = vadd.f32 %v1007_v62, %v4397_v38  ;;  %v3054_v37 = vand.u32 %v4460_v24, %v4043_v16 }
 0x12d   : > { %v956_v40 = vpop.f32.mrf.mxu0  ;;  %v1009_v10 = vpop.f32.mrf.mxu1 }
 0x12e   : > { %v4550_v36 = vadd.f32 %v956_v40, %v4403_v41  ;;  %v4553_v3 = vadd.f32 %v1009_v10, %v4405_v42 }
 0x12f   : > { %v958_v38 = vpop.f32.mrf.mxu0  ;;  %v1011_v44 = vpop.f32.mrf.mxu1 }
 0x130   : > { %v4560_v5 = vadd.f32 %v958_v38, %v4416_v46  ;;  %v4563_v7 = vadd.f32 %v1011_v44, %v4418_v47 }
 0x131   : > { %v1131_v49 = vpop.f32.mrf.mxu0  ;;  %v1184_v41 = vpop.f32.mrf.mxu1  ;;  %3766 = vmatmul.mubr.msk.bf16.vlgmr.msra.gmra.mxu0 %vm479_vm3, %v3861_v35  ;;  %3768 = vmatmul.mubr.msk.bf16.vlgmr.msra.gmra.mxu1 %vm479_vm3, %v3861_v35 }
 0x132   : > { %v4568_v42 = vadd.f32 %v1131_v49, %v4428_v57  ;;  %v4571_v21 = vadd.f32 %v1184_v41, %v4431_v60  ;;  %3180 = vmatpush1.bf16.msra.mxu0 %v3048_v4  ;;  %3233 = vmatpush1.bf16.msra.mxu1 %v3054_v37  ;;  %v3863_v60 = vld [vmem:[%s5264_s3 + $0x88] sm:$0xff]  }
 0x133   : > { %v1133_v16 = vpop.f32.mrf.mxu0  ;;  %v1186_v46 = vpop.f32.mrf.mxu1  ;;  %3101 = vmatprep.mubr.bf16.mxu0 %v3924_v6  ;;  %3154 = vmatprep.mubr.bf16.mxu1 %v3924_v6 }
 0x134   : > { %v4576_v47 = vadd.f32 %v1133_v16, %v4436_v1  ;;  %v4579_v24 = vadd.f32 %v1186_v46, %v4439_v8 }
 0x135   : > { %v1135_v50 = vpop.f32.mrf.mxu0  ;;  %v1188_v57 = vpop.f32.mrf.mxu1 }
 0x136   : > { %v4585_v11 = vadd.f32 %v1135_v50, %v4445_v13  ;;  %v4588_v63 = vadd.f32 %v1188_v57, %v4448_v14 }
 0x137   : > { %v1137_v12 = vpop.f32.mrf.mxu0  ;;  %v1190_v0 = vpop.f32.mrf.mxu1 }
 0x138   : > { %v4591_v1 = vadd.f32 %v1137_v12, %v4451_v56  ;;  %v4594_v8 = vadd.f32 %v1190_v0, %v4454_v20 }
 0x139   : > { %v1141_v18 = vpop.f32.mrf.mxu0  ;;  %v1194_v34 = vpop.f32.mrf.mxu1  ;;  %3767 = vmatmul.mubr.msk.bf16.gmra.mxu0 %vm479_vm3, %v3863_v60  ;;  %3769 = vmatmul.mubr.msk.bf16.gmra.mxu1 %vm479_vm3, %v3863_v60 }
 0x13a   : > { %v4599_v13 = vadd.f32 %v1141_v18, %v4465_v59  ;;  %v4602_v14 = vadd.f32 %v1194_v34, %v4468_v61  ;;  %3197 = vmatprep.mubr.bf16.mxu0 %v3924_v6  ;;  %3250 = vmatprep.mubr.bf16.mxu1 %v3924_v6 }
 0x13b   : > { %v1143_v56 = vpop.f32.mrf.mxu0  ;;  %v1196_v22 = vpop.f32.mrf.mxu1 }
 0x13c   : > { %v4607_v20 = vadd.f32 %v1143_v56, %v4473_v15  ;;  %v4610_v43 = vadd.f32 %v1196_v22, %v4476_v39 }
 0x13d   : > { %v1145_v55 = vpop.f32.mrf.mxu0  ;;  %v1198_v19 = vpop.f32.mrf.mxu1 }
 0x13e   : > { %v4613_v59 = vadd.f32 %v1145_v55, %v4483_v45  ;;  %v4616_v61 = vadd.f32 %v1198_v19, %v4486_v48 }
 0x13f   : > { %v1147_v26 = vpop.f32.mrf.mxu0  ;;  %v1200_v58 = vpop.f32.mrf.mxu1 }
 0x140   : > { %v4619_v31 = vadd.f32 %v1147_v26, %v4493_v51  ;;  %v4622_v62 = vadd.f32 %v1200_v58, %v4496_v54 }
 0x141   : > { %v1237_v15 = vpop.f32.mrf.mxu0  ;;  %v1290_v40 = vpop.f32.mrf.mxu1  ;;  %3770 = vmatmul.mubr.msk.bf16.vlgmr.msra.gmra.mxu0 %vm479_vm3, %v3861_v35  ;;  %3772 = vmatmul.mubr.msk.bf16.vlgmr.msra.gmra.mxu1 %vm479_vm3, %v3861_v35 }
 0x142   : > { %v4627_v39 = vadd.f32 %v1237_v15, %v4505_v33  ;;  %v4630_v45 = vadd.f32 %v1290_v40, %v4508_v17  ;;  %3207 = vmatprep.mubr.bf16.mxu0 %v3924_v6  ;;  %3260 = vmatprep.mubr.bf16.mxu1 %v3924_v6 }
 0x143   : > { %v1239_v48 = vpop.f32.mrf.mxu0  ;;  %v1292_v51 = vpop.f32.mrf.mxu1 }
 0x144   : > { %v4635_v54 = vadd.f32 %v1239_v48, %v4513_v52  ;;  %v4638_v10 = vadd.f32 %v1292_v51, %v4516_v9 }
 0x145   : > { %v1241_v4 = vpop.f32.mrf.mxu0  ;;  %v1294_v35 = vpop.f32.mrf.mxu1 }
 0x146   : > { %v4641_v33 = vadd.f32 %v1241_v4, %v4519_v23  ;;  %v4644_v17 = vadd.f32 %v1294_v35, %v4522_v53 }
 0x147   : > { %v1243_v37 = vpop.f32.mrf.mxu0  ;;  %v1296_v38 = vpop.f32.mrf.mxu1 }
 0x148   : > { %v4647_v6 = vadd.f32 %v1243_v37, %v4525_v27  ;;  %v4650_v44 = vadd.f32 %v1296_v38, %v4528_v25 }
 0x149   : > { %v1247_v52 = vpop.f32.mrf.mxu0  ;;  %v1300_v49 = vpop.f32.mrf.mxu1  ;;  %3771 = vmatmul.mubr.msk.bf16.gmra.mxu0 %vm479_vm3, %v3863_v60  ;;  %3773 = vmatmul.mubr.msk.bf16.gmra.mxu1 %vm479_vm3, %v3863_v60 }
 0x14a   : > { %v4655_v9 = vadd.f32 %v1247_v52, %v4533_v29  ;;  %v4658_v23 = vadd.f32 %v1300_v49, %v4536_v30 }
 0x14b   : > { %v1249_v53 = vpop.f32.mrf.mxu0  ;;  %v1302_v41 = vpop.f32.mrf.mxu1 }
 0x14c   : > { %v4661_v27 = vadd.f32 %v1249_v53, %v4541_v32  ;;  %v4664_v25 = vadd.f32 %v1302_v41, %v4544_v28 }
 0x14d   : > { %v1251_v16 = vpop.f32.mrf.mxu0  ;;  %v1304_v46 = vpop.f32.mrf.mxu1 }
 0x14e   : > { %v4667_v50 = vadd.f32 %v1251_v16, %v4550_v36  ;;  %v4670_v57 = vadd.f32 %v1304_v46, %v4553_v3 }
 0x14f   : > { %v1253_v29 = vpop.f32.mrf.mxu0  ;;  %v1306_v60 = vpop.f32.mrf.mxu1 }
 0x150   : > { %v4673_v30 = vadd.f32 %v1253_v29, %v4560_v5  ;;  %v4676_v12 = vadd.f32 %v1306_v60, %v4563_v7 }
 0x151   : > { %v1458_v32 = vpop.f32.mrf.mxu0  ;;  %v1511_v0 = vpop.f32.mrf.mxu1 }
 0x152   : > { %v4679_v28 = vadd.f32 %v1458_v32, %v4568_v42  ;;  %v4682_v18 = vadd.f32 %v1511_v0, %v4571_v21 }
 0x153   : > { %v1460_v36 = vpop.f32.mrf.mxu0  ;;  %v1513_v34 = vpop.f32.mrf.mxu1 }
 0x154   : > { %v4685_v3 = vadd.f32 %v1460_v36, %v4576_v47  ;;  %v4688_v56 = vadd.f32 %v1513_v34, %v4579_v24 }
 0x155   : > { %v1462_v5 = vpop.f32.mrf.mxu0  ;;  %v1515_v22 = vpop.f32.mrf.mxu1 }
 0x156   : > { %v4691_v7 = vadd.f32 %v1462_v5, %v4585_v11  ;;  %v4694_v55 = vadd.f32 %v1515_v22, %v4588_v63 }
 0x157   : > { %v1464_v42 = vpop.f32.mrf.mxu0  ;;  %v1517_v19 = vpop.f32.mrf.mxu1 }
 0x158   : > { %v4697_v21 = vadd.f32 %v1464_v42, %v4591_v1  ;;  %v4700_v26 = vadd.f32 %v1517_v19, %v4594_v8 }
 0x159   : > { %v1468_v47 = vpop.f32.mrf.mxu0  ;;  %v1521_v58 = vpop.f32.mrf.mxu1 }
 0x15a   : > { %v4703_v24 = vadd.f32 %v1468_v47, %v4599_v13  ;;  %v4706_v15 = vadd.f32 %v1521_v58, %v4602_v14 }
 0x15b   : > { %v1470_v11 = vpop.f32.mrf.mxu0  ;;  %v1523_v40 = vpop.f32.mrf.mxu1 }
 0x15c   : > { %v4709_v63 = vadd.f32 %v1470_v11, %v4607_v20  ;;  %v4712_v48 = vadd.f32 %v1523_v40, %v4610_v43 }
 0x15d   : > { %v1472_v1 = vpop.f32.mrf.mxu0  ;;  %v1525_v51 = vpop.f32.mrf.mxu1 }
 0x15e   : > { %v4715_v8 = vadd.f32 %v1472_v1, %v4613_v59  ;;  %v4718_v4 = vadd.f32 %v1525_v51, %v4616_v61 }
 0x15f   : > { %v1474_v13 = vpop.f32.mrf.mxu0  ;;  %v1527_v35 = vpop.f32.mrf.mxu1 }
 0x160   : > { %v4721_v14 = vadd.f32 %v1474_v13, %v4619_v31  ;;  %v4724_v37 = vadd.f32 %v1527_v35, %v4622_v62 }
 0x161   : > { %v1564_v20 = vpop.f32.mrf.mxu0  ;;  %v1617_v38 = vpop.f32.mrf.mxu1 }
 0x162   : > { %v4727_v43 = vadd.f32 %v1564_v20, %v4627_v39  ;;  %v4730_v52 = vadd.f32 %v1617_v38, %v4630_v45 }
 0x163   : > { %v1566_v59 = vpop.f32.mrf.mxu0  ;;  %v1619_v49 = vpop.f32.mrf.mxu1 }
 0x164   : > { %v4733_v61 = vadd.f32 %v1566_v59, %v4635_v54  ;;  %v4736_v53 = vadd.f32 %v1619_v49, %v4638_v10 }
 0x165   : > { %v1568_v31 = vpop.f32.mrf.mxu0  ;;  %v1621_v41 = vpop.f32.mrf.mxu1 }
 0x166   : > { %v4739_v62 = vadd.f32 %v1568_v31, %v4641_v33  ;;  %v4742_v16 = vadd.f32 %v1621_v41, %v4644_v17 }
 0x167   : > { %v1570_v39 = vpop.f32.mrf.mxu0  ;;  %v1623_v46 = vpop.f32.mrf.mxu1 }
 0x168   : > { %v4745_v45 = vadd.f32 %v1570_v39, %v4647_v6  ;;  %v4748_v29 = vadd.f32 %v1623_v46, %v4650_v44 }
 0x169   : > { %v1574_v54 = vpop.f32.mrf.mxu0  ;;  %v1627_v60 = vpop.f32.mrf.mxu1 }
 0x16a   : > { %v4751_v10 = vadd.f32 %v1574_v54, %v4655_v9  ;;  %v4754_v32 = vadd.f32 %v1627_v60, %v4658_v23 }
 0x16b   : > { %v1576_v33 = vpop.f32.mrf.mxu0  ;;  %v1629_v0 = vpop.f32.mrf.mxu1 }
 0x16c   : > { %v4757_v17 = vadd.f32 %v1576_v33, %v4661_v27  ;;  %v4760_v36 = vadd.f32 %v1629_v0, %v4664_v25 }
 0x16d   : > { %v1578_v6 = vpop.f32.mrf.mxu0  ;;  %v1631_v34 = vpop.f32.mrf.mxu1 }
 0x16e   : > { %v4763_v44 = vadd.f32 %v1578_v6, %v4667_v50  ;;  %v4766_v5 = vadd.f32 %v1631_v34, %v4670_v57 }
 0x16f   : > { %v1580_v9 = vpop.f32.mrf.mxu0  ;;  %v1633_v22 = vpop.f32.mrf.mxu1 }
 0x170   : > { %v4769_v23 = vadd.f32 %v1580_v9, %v4673_v30  ;;  %v4772_v42 = vadd.f32 %v1633_v22, %v4676_v12 }
 0x171   : > { %v1785_v27 = vpop.f32.mrf.mxu0  ;;  %v1838_v19 = vpop.f32.mrf.mxu1 }
 0x172   : > { %v4775_v25 = vadd.f32 %v1785_v27, %v4679_v28  ;;  %v4778_v47 = vadd.f32 %v1838_v19, %v4682_v18 }
 0x173   : > { %v1787_v50 = vpop.f32.mrf.mxu0  ;;  %v1840_v58 = vpop.f32.mrf.mxu1 }
 0x174   : > { %v4781_v57 = vadd.f32 %v1787_v50, %v4685_v3  ;;  %v4784_v11 = vadd.f32 %v1840_v58, %v4688_v56 }
 0x175   : > { %v1789_v30 = vpop.f32.mrf.mxu0  ;;  %v1842_v40 = vpop.f32.mrf.mxu1 }
 0x176   : > { %v4787_v12 = vadd.f32 %v1789_v30, %v4691_v7  ;;  %v4790_v1 = vadd.f32 %v1842_v40, %v4694_v55 }
 0x177   : > { %v1791_v28 = vpop.f32.mrf.mxu0  ;;  %v1844_v51 = vpop.f32.mrf.mxu1 }
 0x178   : > { %v4793_v18 = vadd.f32 %v1791_v28, %v4697_v21  ;;  %v4796_v13 = vadd.f32 %v1844_v51, %v4700_v26 }
 0x179   : > { %v1795_v3 = vpop.f32.mrf.mxu0  ;;  %v1848_v35 = vpop.f32.mrf.mxu1 }
 0x17a   : > { %v4799_v56 = vadd.f32 %v1795_v3, %v4703_v24  ;;  %v4802_v20 = vadd.f32 %v1848_v35, %v4706_v15 }
 0x17b   : > { %v1797_v7 = vpop.f32.mrf.mxu0  ;;  %v1850_v38 = vpop.f32.mrf.mxu1 }
 0x17c   : > { %v4805_v55 = vadd.f32 %v1797_v7, %v4709_v63  ;;  %v4808_v59 = vadd.f32 %v1850_v38, %v4712_v48 }
 0x17d   : > { %v1799_v21 = vpop.f32.mrf.mxu0  ;;  %v1852_v49 = vpop.f32.mrf.mxu1 }
 0x17e   : > { %v4811_v26 = vadd.f32 %v1799_v21, %v4715_v8  ;;  %v4814_v31 = vadd.f32 %v1852_v49, %v4718_v4 }
 0x17f   : > { %v1801_v24 = vpop.f32.mrf.mxu0  ;;  %v1854_v41 = vpop.f32.mrf.mxu1 }
 0x180   : > { %v4817_v15 = vadd.f32 %v1801_v24, %v4721_v14  ;;  %v4820_v39 = vadd.f32 %v1854_v41, %v4724_v37 }
 0x181   : > { %v1891_v63 = vpop.f32.mrf.mxu0  ;;  %v1944_v46 = vpop.f32.mrf.mxu1 }
 0x182   : > { %v4823_v48 = vadd.f32 %v1891_v63, %v4727_v43  ;;  %v4826_v54 = vadd.f32 %v1944_v46, %v4730_v52 }
 0x183   : > { %v1893_v8 = vpop.f32.mrf.mxu0  ;;  %v1946_v60 = vpop.f32.mrf.mxu1 }
 0x184   : > { %v4829_v4 = vadd.f32 %v1893_v8, %v4733_v61  ;;  %v4832_v33 = vadd.f32 %v1946_v60, %v4736_v53 }
 0x185   : > { %v1895_v14 = vpop.f32.mrf.mxu0  ;;  %v1948_v0 = vpop.f32.mrf.mxu1 }
 0x186   : > { %v4835_v37 = vadd.f32 %v1895_v14, %v4739_v62  ;;  %v4838_v6 = vadd.f32 %v1948_v0, %v4742_v16 }
 0x187   : > { %v1897_v43 = vpop.f32.mrf.mxu0  ;;  %v1950_v34 = vpop.f32.mrf.mxu1 }
 0x188   : > { %v4841_v52 = vadd.f32 %v1897_v43, %v4745_v45  ;;  %v4844_v9 = vadd.f32 %v1950_v34, %v4748_v29 }
 0x189   : > { %v1901_v61 = vpop.f32.mrf.mxu0  ;;  %v1954_v22 = vpop.f32.mrf.mxu1 }
 0x18a   : > { %v4847_v53 = vadd.f32 %v1901_v61, %v4751_v10  ;;  %v4850_v27 = vadd.f32 %v1954_v22, %v4754_v32 }
 0x18b   : > { %v1903_v62 = vpop.f32.mrf.mxu0  ;;  %v1956_v19 = vpop.f32.mrf.mxu1 }
 0x18c   : > { %v4853_v16 = vadd.f32 %v1903_v62, %v4757_v17  ;;  %v4856_v50 = vadd.f32 %v1956_v19, %v4760_v36 }
 0x18d   : > { %v1905_v45 = vpop.f32.mrf.mxu0  ;;  %v1958_v58 = vpop.f32.mrf.mxu1 }
 0x18e   : > { %v4859_v29 = vadd.f32 %v1905_v45, %v4763_v44  ;;  %v4862_v30 = vadd.f32 %v1958_v58, %v4766_v5 }
 0x18f   : > { %v1907_v10 = vpop.f32.mrf.mxu0  ;;  %v1960_v40 = vpop.f32.mrf.mxu1 }
 0x190   : > { %v4865_v32 = vadd.f32 %v1907_v10, %v4769_v23  ;;  %v4868_v28 = vadd.f32 %v1960_v40, %v4772_v42 }
 0x191   : > { %v2112_v17 = vpop.f32.mrf.mxu0  ;;  %v2165_v51 = vpop.f32.mrf.mxu1 }
 0x192   : > { %v4871_v36 = vadd.f32 %v2112_v17, %v4775_v25  ;;  %v4874_v3 = vadd.f32 %v2165_v51, %v4778_v47 }
 0x193   : > { %v2114_v44 = vpop.f32.mrf.mxu0  ;;  %v2167_v35 = vpop.f32.mrf.mxu1 }
 0x194   : > { %v4877_v5 = vadd.f32 %v2114_v44, %v4781_v57  ;;  %v4880_v7 = vadd.f32 %v2167_v35, %v4784_v11 }
 0x195   : > { %v2116_v23 = vpop.f32.mrf.mxu0  ;;  %v2169_v38 = vpop.f32.mrf.mxu1 }
 0x196   : > { %v4883_v42 = vadd.f32 %v2116_v23, %v4787_v12  ;;  %v4886_v21 = vadd.f32 %v2169_v38, %v4790_v1 }
 0x197   : > { %v2118_v25 = vpop.f32.mrf.mxu0  ;;  %v2171_v49 = vpop.f32.mrf.mxu1 }
 0x198   : > { %v4889_v47 = vadd.f32 %v2118_v25, %v4793_v18  ;;  %v4892_v24 = vadd.f32 %v2171_v49, %v4796_v13 }
 0x199   : > { %v2122_v57 = vpop.f32.mrf.mxu0  ;;  %v2175_v41 = vpop.f32.mrf.mxu1 }
 0x19a   : > { %v4895_v11 = vadd.f32 %v2122_v57, %v4799_v56  ;;  %v4898_v63 = vadd.f32 %v2175_v41, %v4802_v20 }
 0x19b   : > { %v2124_v12 = vpop.f32.mrf.mxu0  ;;  %v2177_v46 = vpop.f32.mrf.mxu1 }
 0x19c   : > { %v4901_v1 = vadd.f32 %v2124_v12, %v4805_v55  ;;  %v4904_v8 = vadd.f32 %v2177_v46, %v4808_v59 }
 0x19d   : > { %v2126_v18 = vpop.f32.mrf.mxu0  ;;  %v2179_v60 = vpop.f32.mrf.mxu1 }
 0x19e   : > { %v4907_v13 = vadd.f32 %v2126_v18, %v4811_v26  ;;  %v4910_v14 = vadd.f32 %v2179_v60, %v4814_v31 }
 0x19f   : > { %v2128_v56 = vpop.f32.mrf.mxu0  ;;  %v2181_v0 = vpop.f32.mrf.mxu1 }
 0x1a0   : > { %v4913_v20 = vadd.f32 %v2128_v56, %v4817_v15  ;;  %v4916_v43 = vadd.f32 %v2181_v0, %v4820_v39 }
 0x1a1   : > { %v2218_v55 = vpop.f32.mrf.mxu0  ;;  %v2271_v34 = vpop.f32.mrf.mxu1 }
 0x1a2   : > { %v4919_v59 = vadd.f32 %v2218_v55, %v4823_v48  ;;  %v4922_v61 = vadd.f32 %v2271_v34, %v4826_v54 }
 0x1a3   : > { %v2220_v26 = vpop.f32.mrf.mxu0  ;;  %v2273_v22 = vpop.f32.mrf.mxu1 }
 0x1a4   : > { %v4925_v31 = vadd.f32 %v2220_v26, %v4829_v4  ;;  %v4928_v62 = vadd.f32 %v2273_v22, %v4832_v33 }
 0x1a5   : > { %v2222_v15 = vpop.f32.mrf.mxu0  ;;  %v2275_v19 = vpop.f32.mrf.mxu1 }
 0x1a6   : > { %v4931_v39 = vadd.f32 %v2222_v15, %v4835_v37  ;;  %v4934_v45 = vadd.f32 %v2275_v19, %v4838_v6 }
 0x1a7   : > { %v2224_v48 = vpop.f32.mrf.mxu0  ;;  %v2277_v58 = vpop.f32.mrf.mxu1 }
 0x1a8   : > { %v4937_v54 = vadd.f32 %v2224_v48, %v4841_v52  ;;  %v4940_v10 = vadd.f32 %v2277_v58, %v4844_v9 }
 0x1a9   : > { %v2228_v4 = vpop.f32.mrf.mxu0  ;;  %v2281_v40 = vpop.f32.mrf.mxu1 }
 0x1aa   : > { %v4943_v33 = vadd.f32 %v2228_v4, %v4847_v53  ;;  %v4946_v17 = vadd.f32 %v2281_v40, %v4850_v27 }
 0x1ab   : > { %v2230_v37 = vpop.f32.mrf.mxu0  ;;  %v2283_v51 = vpop.f32.mrf.mxu1 }
 0x1ac   : > { %v4949_v6 = vadd.f32 %v2230_v37, %v4853_v16  ;;  %v4952_v44 = vadd.f32 %v2283_v51, %v4856_v50 }
 0x1ad   : > { %v2232_v52 = vpop.f32.mrf.mxu0  ;;  %v2285_v35 = vpop.f32.mrf.mxu1 }
 0x1ae   : > { %v4955_v9 = vadd.f32 %v2232_v52, %v4859_v29  ;;  %v4958_v23 = vadd.f32 %v2285_v35, %v4862_v30 }
 0x1af   : > { %v2234_v53 = vpop.f32.mrf.mxu0  ;;  %v2287_v38 = vpop.f32.mrf.mxu1 }
 0x1b0   : > { %5271 = vst [vmem:[#allocation3_spill] sm:$0xff] %v4958_v23  ;;  %v4961_v27 = vadd.f32 %v2234_v53, %v4865_v32  ;;  %v4964_v25 = vadd.f32 %v2287_v38, %v4868_v28 }
 0x1b1   : > { %v2439_v16 = vpop.f32.mrf.mxu0  ;;  %v2492_v49 = vpop.f32.mrf.mxu1 }
 0x1b2   : > { %5272 = vst [vmem:[#allocation4_spill] sm:$0xff] %v4961_v27  ;;  %5273 = vst [vmem:[#allocation5_spill] sm:$0xff] %v4964_v25  ;;  %v4967_v50 = vadd.f32 %v2439_v16, %v4871_v36  ;;  %v4970_v57 = vadd.f32 %v2492_v49, %v4874_v3 }
 0x1b3   : > { %v2441_v29 = vpop.f32.mrf.mxu0  ;;  %v2494_v41 = vpop.f32.mrf.mxu1 }
 0x1b4   : > { %5274 = vst [vmem:[#allocation6_spill] sm:$0xff] %v4967_v50  ;;  %5275 = vst [vmem:[#allocation7_spill] sm:$0xff] %v4970_v57  ;;  %v4973_v30 = vadd.f32 %v2441_v29, %v4877_v5  ;;  %v4976_v12 = vadd.f32 %v2494_v41, %v4880_v7 }
 0x1b5   : > { %v2443_v32 = vpop.f32.mrf.mxu0  ;;  %v2496_v46 = vpop.f32.mrf.mxu1 }
 0x1b6   : > { %5276 = vst [vmem:[#allocation8_spill] sm:$0xff] %v4973_v30  ;;  %5277 = vst [vmem:[#allocation9_spill] sm:$0xff] %v4976_v12  ;;  %v4979_v28 = vadd.f32 %v2443_v32, %v4883_v42  ;;  %v4982_v18 = vadd.f32 %v2496_v46, %v4886_v21 }
 0x1b7   : > { %v2445_v36 = vpop.f32.mrf.mxu0  ;;  %v2498_v60 = vpop.f32.mrf.mxu1 }
 0x1b8   : > { %5278 = vst [vmem:[#allocation10_spill] sm:$0xff] %v4979_v28  ;;  %5279 = vst [vmem:[#allocation11_spill] sm:$0xff] %v4982_v18  ;;  %v4985_v3 = vadd.f32 %v2445_v36, %v4889_v47  ;;  %v4988_v56 = vadd.f32 %v2498_v60, %v4892_v24 }
 0x1b9   : > { %v2449_v5 = vpop.f32.mrf.mxu0  ;;  %v2502_v0 = vpop.f32.mrf.mxu1 }
 0x1ba   : > { %5280 = vst [vmem:[#allocation12_spill] sm:$0xff] %v4985_v3  ;;  %5281 = vst [vmem:[#allocation13_spill] sm:$0xff] %v4988_v56  ;;  %v4991_v7 = vadd.f32 %v2449_v5, %v4895_v11  ;;  %v4994_v55 = vadd.f32 %v2502_v0, %v4898_v63 }
 0x1bb   : > { %v2451_v42 = vpop.f32.mrf.mxu0  ;;  %v2504_v34 = vpop.f32.mrf.mxu1 }
 0x1bc   : > { %5282 = vst [vmem:[#allocation14_spill] sm:$0xff] %v4991_v7  ;;  %5283 = vst [vmem:[#allocation15_spill] sm:$0xff] %v4994_v55  ;;  %v4997_v21 = vadd.f32 %v2451_v42, %v4901_v1  ;;  %v5000_v26 = vadd.f32 %v2504_v34, %v4904_v8 }
 0x1bd   : > { %v2453_v47 = vpop.f32.mrf.mxu0  ;;  %v2506_v22 = vpop.f32.mrf.mxu1 }
 0x1be   : > { %5284 = vst [vmem:[#allocation16_spill] sm:$0xff] %v4997_v21  ;;  %5285 = vst [vmem:[#allocation17_spill] sm:$0xff] %v5000_v26  ;;  %v5003_v24 = vadd.f32 %v2453_v47, %v4907_v13  ;;  %v5006_v15 = vadd.f32 %v2506_v22, %v4910_v14 }
 0x1bf   : > { %v2455_v11 = vpop.f32.mrf.mxu0  ;;  %v2508_v19 = vpop.f32.mrf.mxu1 }
 0x1c0   : > { %5286 = vst [vmem:[#allocation18_spill] sm:$0xff] %v5003_v24  ;;  %5287 = vst [vmem:[#allocation19_spill] sm:$0xff] %v5006_v15  ;;  %v5009_v63 = vadd.f32 %v2455_v11, %v4913_v20  ;;  %v5012_v48 = vadd.f32 %v2508_v19, %v4916_v43 }
 0x1c1   : > { %v2545_v1 = vpop.f32.mrf.mxu0  ;;  %v2598_v58 = vpop.f32.mrf.mxu1 }
 0x1c2   : > { %5288 = vst [vmem:[#allocation20_spill] sm:$0xff] %v5009_v63  ;;  %5289 = vst [vmem:[#allocation21_spill] sm:$0xff] %v5012_v48  ;;  %v2621_v18 = vadd.f32 %v2545_v1, %v4919_v59  ;;  %v2623_v28 = vadd.f32 %v2598_v58, %v4922_v61 }
 0x1c3   : > { %v2547_v8 = vpop.f32.mrf.mxu0  ;;  %v2600_v4 = vpop.f32.mrf.mxu1 }
 0x1c4   : > { %v2622_v12 = vadd.f32 %v2547_v8, %v4925_v31  ;;  %v2624_v30 = vadd.f32 %v2600_v4, %v4928_v62 }
 0x1c5   : > { %v2549_v40 = vpop.f32.mrf.mxu0  ;;  %v2602_v37 = vpop.f32.mrf.mxu1 }
 0x1c6   : > { %v2629_v25 = vadd.f32 %v2549_v40, %v4931_v39  ;;  %v2631_v27 = vadd.f32 %v2602_v37, %v4934_v45  ;;  %v5291_v45 = vld [vmem:[#allocation3_spill] sm:$0xff]  ;;  %v5297_v37 = vld [vmem:[#allocation8_spill] sm:$0xff] }
 0x1c7   : > { %v2551_v51 = vpop.f32.mrf.mxu0  ;;  %v2604_v13 = vpop.f32.mrf.mxu1  ;;  %v5296_v40 = vld [vmem:[#allocation7_spill] sm:$0xff] }
 0x1c8   : > { %v2630_v23 = vadd.f32 %v2551_v51, %v4937_v54  ;;  %v5292_v54 = vld [vmem:[#allocation4_spill] sm:$0xff] }
 0x1c9   : > { %v2555_v52 = vpop.f32.mrf.mxu0  ;;  %v2608_v35 = vpop.f32.mrf.mxu1 }
 0x1ca   : > { %v2637_v59 = vadd.f32 %v2555_v52, %v4943_v33  ;;  %v2639_v61 = vadd.f32 %v2608_v35, %v4946_v17  ;;  %v5293_v33 = vld [vmem:[#allocation5_spill] sm:$0xff]  ;;  %v5295_v17 = vld [vmem:[#allocation6_spill] sm:$0xff] }
 0x1cb   : > { %v2557_v14 = vpop.f32.mrf.mxu0  ;;  %v2610_v53 = vpop.f32.mrf.mxu1 }
 0x1cc   : > { %v2638_v31 = vadd.f32 %v2557_v14, %v4949_v6  ;;  %v2640_v62 = vadd.f32 %v2610_v53, %v4952_v44  ;;  %v5301_v14 = vld [vmem:[#allocation10_spill] sm:$0xff] }
 0x1cd   : > { %v2559_v38 = vpop.f32.mrf.mxu0  ;;  %v2612_v16 = vpop.f32.mrf.mxu1 }
 0x1ce   : > { %v5037_v39 = vadd.f32 %v2559_v38, %v4955_v9  ;;  %v5040_v8 = vadd.f32 %v2612_v16, %v5291_v45  ;;  %v5302_v38 = vld [vmem:[#allocation11_spill] sm:$0xff] }
 0x1cf   : > { %v2561_v49 = vpop.f32.mrf.mxu0  ;;  %v2614_v20 = vpop.f32.mrf.mxu1 }
 0x1d0   : > { %v5046_v4 = vadd.f32 %v2614_v20, %v5293_v33  ;;  %v5304_v20 = vld [vmem:[#allocation13_spill] sm:$0xff]  ;;  %v5060_v33 = vpop.permute.xlu0 %3309 }
 0x1d1   : > { %v2766_v29 = vpop.f32.mrf.mxu0  ;;  %v2819_v41 = vpop.f32.mrf.mxu1 }
 0x1d2   : > { %5294 = vst [vmem:[#allocation3_spill] sm:$0xff] %v5046_v4  ;;  %v2944_v6 = vadd.f32 %v2766_v29, %v5295_v17  ;;  %v2946_v44 = vadd.f32 %v2819_v41, %v5296_v40  ;;  %v5305_v29 = vld [vmem:[#allocation14_spill] sm:$0xff]  ;;  %v5306_v17 = vld [vmem:[#allocation15_spill] sm:$0xff]  ;;  %v5307_v40 = vld [vmem:[#allocation16_spill] sm:$0xff] }
 0x1d3   : > { %v2768_v43 = vpop.f32.mrf.mxu0  ;;  %v2821_v32 = vpop.f32.mrf.mxu1 }
 0x1d4   : > { %v2945_v51 = vadd.f32 %v2768_v43, %v5297_v37  ;;  %v5308_v37 = vld [vmem:[#allocation17_spill] sm:$0xff] }
 0x1d5   : > { %v2770_v46 = vpop.f32.mrf.mxu0  ;;  %v2823_v36 = vpop.f32.mrf.mxu1 }
 0x1d6   : > { %v2952_v53 = vadd.f32 %v2770_v46, %v5301_v14  ;;  %v2954_v16 = vadd.f32 %v2823_v36, %v5302_v38  ;;  %v5310_v36 = vld [vmem:[#allocation19_spill] sm:$0xff]  ;;  %v5311_v38 = vld [vmem:[#allocation20_spill] sm:$0xff] }
 0x1d7   : > { %v2772_v60 = vpop.f32.mrf.mxu0  ;;  %v2825_v5 = vpop.f32.mrf.mxu1 }
 0x1d9   : > { %v2776_v0 = vpop.f32.mrf.mxu0  ;;  %v2829_v42 = vpop.f32.mrf.mxu1 }
 0x1da   : > { %v2960_v41 = vadd.f32 %v2776_v0, %v5305_v29  ;;  %v2962_v43 = vadd.f32 %v2829_v42, %v5306_v17  ;;  %v5312_v0 = vld [vmem:[#allocation21_spill] sm:$0xff] }
 0x1db   : > { %v2778_v34 = vpop.f32.mrf.mxu0  ;;  %v2831_v47 = vpop.f32.mrf.mxu1 }
 0x1dd   : > { %v2780_v22 = vpop.f32.mrf.mxu0  ;;  %v2833_v11 = vpop.f32.mrf.mxu1 }
 0x1de   : > { %v5070_v14 = vadd.f32 %v2833_v11, %v5310_v36 }
 0x1df   : > { %v2782_v19 = vpop.f32.mrf.mxu0  ;;  %v2835_v2 = vpop.f32.mrf.mxu1 }
 0x1e1   : > { %v2872_v48 = vpop.f32.mrf.mxu0  ;;  %v2925_v63 = vpop.f32.mrf.mxu1 }
 0x1e2   : > { %v5078_v42 = vadd.f32 %v2872_v48, %v2621_v18 }
 0x1e3   : > { %v2874_v15 = vpop.f32.mrf.mxu0  ;;  %v2927_v24 = vpop.f32.mrf.mxu1 }
 0x1e4   : > { %v5082_v17 = vadd.f32 %v2874_v15, %v2622_v12 }
 0x1e5   : > { %v2876_v26 = vpop.f32.mrf.mxu0  ;;  %v2929_v21 = vpop.f32.mrf.mxu1 }
 0x1e7   : > { %v2878_v55 = vpop.f32.mrf.mxu0  ;;  %v2931_v7 = vpop.f32.mrf.mxu1 }
 0x1e9   : > { %v2882_v56 = vpop.f32.mrf.mxu0  ;;  %v5014_v3 = vpop.f32.mrf.mxu1 }
 0x1ea   : > { %5290 = vst [vmem:[#allocation22_spill] sm:$0xff] %v5014_v3  ;;  %v2632_v3 = vadd.f32 %v2604_v13, %v4940_v10  ;;  %v5043_v10 = vadd.f32 %v2561_v49, %v5292_v54  ;;  %v5298_v13 = vld [vmem:[#allocation9_spill] sm:$0xff]  ;;  %v5303_v49 = vld [vmem:[#allocation12_spill] sm:$0xff]  ;;  %v2955_v54 = vadd.f32 %v2825_v5, %v5304_v20  ;;  %v5076_v20 = vadd.f32 %v2835_v2, %v5312_v0 }
 0x1eb   : > { %v5020_v57 = vpop.f32.mrf.mxu0  ;;  %v5022_v50 = vpop.f32.mrf.mxu1  ;;  %v2947_v52 = vadd.f32 %v2821_v32, %v5298_v13  ;;  %v2953_v45 = vadd.f32 %v2772_v60, %v5303_v49  ;;  %v2961_v32 = vadd.f32 %v2778_v34, %v5307_v40  ;;  %v2963_v13 = vadd.f32 %v2831_v47, %v5308_v37 }
 0x1ec   : > { %v5073_v49 = vadd.f32 %v2782_v19, %v5311_v38  ;;  %v5080_v34 = vadd.f32 %v2925_v63, %v2623_v28  ;;  %v5089_v19 = vadd.f32 %v2929_v21, %v2631_v27  ;;  %v5091_v2 = vadd.f32 %v2878_v55, %v2630_v23 }
 0x1ed   : > { %v5032_v1 = vpop.f32.mrf.mxu0  ;;  %v5034_v58 = vpop.f32.mrf.mxu1  ;;  %v5093_v28 = vadd.f32 %v2931_v7, %v2632_v3  ;;  %v5095_v63 = vadd.f32 %v2882_v56, %v2637_v59 }
 0x1ef   : > { %v5052_v35 = vpop.f32.mrf.mxu0  ;;  %v5054_v9 = vpop.f32.mrf.mxu1 }
 0x1f0   : > { %5299 = vst [vmem:[#allocation4_spill] sm:$0xff] %v5052_v35  ;;  %5300 = vst [vmem:[#allocation5_spill] sm:$0xff] %v5054_v9  ;;  %v5309_v35 = vld [vmem:[#allocation18_spill] sm:$0xff] }
 0x1f1   : > { %v3093_v4 = vpop.f32.mrf.mxu0  ;;  %v3146_v9 = vpop.f32.mrf.mxu1  ;;  %v5067_v46 = vadd.f32 %v2780_v22, %v5309_v35 }
 0x1f2   : > { %v3271_v60 = vadd.f32 %v3093_v4, %v2944_v6  ;;  %v3273_v5 = vadd.f32 %v3146_v9, %v2946_v44  ;;  %v5085_v4 = vadd.f32 %v2927_v24, %v2624_v30  ;;  %v5087_v6 = vadd.f32 %v2876_v26, %v2629_v25  ;;  %v5099_v44 = vpop.permute.xlu0 %3314  ;;  %v5101_v30 = vpop.permute.xlu1 %3319  ;;  %v5313_v25 = vld [vmem:[#allocation22_spill] sm:$0xff] }
 0x1f3   : > { %v3095_v47 = vpop.f32.mrf.mxu0  ;;  %v3148_v29 = vpop.f32.mrf.mxu1  ;;  %v5104_v26 = vadd.f32 %v5313_v25, %v2639_v61 }
 0x1f4   : > { %v3272_v22 = vadd.f32 %v3095_v47, %v2945_v51  ;;  %v3327_v11 = vadd.f32 %v5060_v33, %v3271_v60  ;;  %v3274_v35 = vadd.f32 %v3148_v29, %v2947_v52  ;;  %v3329_v15 = vadd.f32 %v5060_v33, %v3273_v5 }
 0x1f5   : > { %v3097_v18 = vpop.f32.mrf.mxu0  ;;  %v3150_v48 = vpop.f32.mrf.mxu1  ;;  %v5108_v51 = vadd.f32 %v5020_v57, %v2638_v31  ;;  %v5111_v52 = vadd.f32 %v5022_v50, %v2640_v62 }
 0x1f6   : > { %v3328_v12 = vadd.f32 %v5060_v33, %v3272_v22  ;;  %v3330_v23 = vadd.f32 %v5060_v33, %v3274_v35  ;;  %v3279_v27 = vadd.f32 %v3097_v18, %v2952_v53  ;;  %v3281_v55 = vadd.f32 %v3150_v48, %v2954_v16  ;;  %v5121_v29 = vpop.permute.xlu1 %3324 }
 0x1f7   : > { %v3099_v21 = vpop.f32.mrf.mxu0  ;;  %v3152_v3 = vpop.f32.mrf.mxu1  ;;  %v3359_v7 = vmax.f32 %v3327_v11, 0.0  ;;  %v3361_v16 = vmax.f32 %v3329_v15, 0.0 }
 0x1f8   : > { %v3360_v56 = vmax.f32 %v3328_v12, 0.0  ;;  %v3280_v24 = vadd.f32 %v3099_v21, %v2953_v45  ;;  %v3282_v59 = vadd.f32 %v3152_v3, %v2955_v54  ;;  %v3335_v9 = vadd.f32 %v5099_v44, %v3279_v27 }
 0x1f9   : > { %v3337_v61 = vadd.f32 %v5099_v44, %v3281_v55  ;;  %v3103_v40 = vpop.f32.mrf.mxu0  ;;  %v3156_v37 = vpop.f32.mrf.mxu1  ;;  %v5118_v45 = vadd.f32 %v5032_v1, %v5037_v39  ;;  %v3362_v57 = vmax.f32 %v3330_v23, 0.0 }
 0x1fa   : > { %v3395_v53 = vadd.f32 %v3360_v56, %v3359_v7  ;;  %v3336_v36 = vadd.f32 %v5099_v44, %v3280_v24  ;;  %v3287_v60 = vadd.f32 %v3103_v40, %v2960_v41  ;;  %v3338_v31 = vadd.f32 %v5099_v44, %v3282_v59 }
 0x1fb   : > { %v3289_v50 = vadd.f32 %v3156_v37, %v2962_v43  ;;  %v3105_v62 = vpop.f32.mrf.mxu0  ;;  %v3158_v54 = vpop.f32.mrf.mxu1  ;;  %v3367_v38 = vmax.f32 %v3335_v9, 0.0  ;;  %v3369_v22 = vmax.f32 %v3337_v61, 0.0  ;;  %v5133_v56 = vadd.f32 %v5034_v58, %v5040_v8 }
 0x1fc   : > { %v3396_v5 = vadd.f32 %v3395_v53, %v3361_v16  ;;  %v3368_v0 = vmax.f32 %v3336_v36, 0.0  ;;  %v3288_v47 = vadd.f32 %v3105_v62, %v2961_v32  ;;  %v3343_v11 = vadd.f32 %v5101_v30, %v3287_v60  ;;  %v5314_v62 = vld [vmem:[#allocation4_spill] sm:$0xff] }
 0x1fd   : > { %v3290_v41 = vadd.f32 %v3158_v54, %v2963_v13  ;;  %v3345_v35 = vadd.f32 %v5101_v30, %v3289_v50  ;;  %v3107_v1 = vpop.f32.mrf.mxu0  ;;  %v3160_v39 = vpop.f32.mrf.mxu1  ;;  %v3370_v15 = vmax.f32 %v3338_v31, 0.0  ;;  %v2973_v54 = vadd.f32 %v5314_v62, %v5043_v10 }
 0x1fe   : > { %v3397_v18 = vadd.f32 %v3396_v5, %v3362_v57  ;;  %v3404_v48 = vadd.f32 %v3368_v0, %v3367_v38  ;;  %v3344_v43 = vadd.f32 %v5101_v30, %v3288_v47  ;;  %v3295_v12 = vadd.f32 %v3107_v1, %v5067_v46  ;;  %v5315_v5 = vld [vmem:[#allocation3_spill] sm:$0xff]  ;;  %v5316_v38 = vld [vmem:[#allocation5_spill] sm:$0xff] }
 0x1ff   : > { %v3375_v25 = vmax.f32 %v3343_v11, 0.0  ;;  %v3346_v32 = vadd.f32 %v5101_v30, %v3290_v41  ;;  %v3297_v23 = vadd.f32 %v3160_v39, %v5070_v14  ;;  %v3109_v27 = vpop.f32.mrf.mxu0  ;;  %v3162_v55 = vpop.f32.mrf.mxu1  ;;  %v3377_v24 = vmax.f32 %v3345_v35, 0.0 }
 0x200   : > { %v3405_v21 = vadd.f32 %v3404_v48, %v3369_v22  ;;  %v3376_v13 = vmax.f32 %v3344_v43, 0.0  ;;  %v3296_v3 = vadd.f32 %v3109_v27, %v5073_v49  ;;  %v3351_v7 = vadd.f32 %v5121_v29, %v3295_v12 }
 0x201   : > { %v3298_v46 = vadd.f32 %v3162_v55, %v5076_v20  ;;  %v3353_v59 = vadd.f32 %v5121_v29, %v3297_v23  ;;  %v3199_v9 = vpop.f32.mrf.mxu0  ;;  %v3252_v61 = vpop.f32.mrf.mxu1  ;;  %v3378_v37 = vmax.f32 %v3346_v32, 0.0  ;;  %v2975_v0 = vadd.f32 %v5316_v38, %v5315_v5 }
 0x202   : > { %v3406_v14 = vadd.f32 %v3405_v21, %v3370_v15  ;;  %v3413_v40 = vadd.f32 %v3376_v13, %v3375_v25  ;;  %v3352_v53 = vadd.f32 %v5121_v29, %v3296_v3  ;;  %v3383_v16 = vmax.f32 %v3351_v7, 0.0 }
 0x203   : > { %v3354_v49 = vadd.f32 %v5121_v29, %v3298_v46  ;;  %v3275_v36 = vadd.f32 %v3199_v9, %v5078_v42  ;;  %v3277_v58 = vadd.f32 %v3252_v61, %v5080_v34  ;;  %v3201_v8 = vpop.f32.mrf.mxu0  ;;  %v3254_v60 = vpop.f32.mrf.mxu1  ;;  %v3385_v47 = vmax.f32 %v3353_v59, 0.0 }
 0x204   : > { %v3414_v57 = vadd.f32 %v3413_v40, %v3377_v24  ;;  %v3384_v20 = vmax.f32 %v3352_v53, 0.0  ;;  %v3276_v31 = vadd.f32 %v3201_v8, %v5082_v17  ;;  %v3278_v50 = vadd.f32 %v3254_v60, %v5085_v4 }
 0x205   : > { %v3331_v22 = vadd.f32 %v5060_v33, %v3275_v36  ;;  %v3203_v42 = vpop.f32.mrf.mxu0  ;;  %v3256_v11 = vpop.f32.mrf.mxu1  ;;  %v3333_v35 = vadd.f32 %v5060_v33, %v3277_v58  ;;  %v3386_v12 = vmax.f32 %v3354_v49, 0.0 }
 0x206   : > { %v3415_v34 = vadd.f32 %v3414_v57, %v3378_v37  ;;  %v3422_v41 = vadd.f32 %v3384_v20, %v3383_v16  ;;  %v3332_v1 = vadd.f32 %v5060_v33, %v3276_v31  ;;  %v3334_v4 = vadd.f32 %v5060_v33, %v3278_v50 }
 0x207   : > { %v3363_v17 = vmax.f32 %v3331_v22, 0.0  ;;  %v3283_v39 = vadd.f32 %v3203_v42, %v5087_v6  ;;  %v3285_v10 = vadd.f32 %v3256_v11, %v5089_v19  ;;  %v3205_v48 = vpop.f32.mrf.mxu0  ;;  %v3258_v43 = vpop.f32.mrf.mxu1  ;;  %v3365_v24 = vmax.f32 %v3333_v35, 0.0 }
 0x208   : > { %v3423_v15 = vadd.f32 %v3422_v41, %v3385_v47  ;;  %v3364_v25 = vmax.f32 %v3332_v1, 0.0  ;;  %v3284_v32 = vadd.f32 %v3205_v48, %v5091_v2  ;;  %v3286_v21 = vadd.f32 %v3258_v43, %v5093_v28 }
 0x209   : > { %v3398_v23 = vadd.f32 %v3397_v18, %v3363_v17  ;;  %v3339_v27 = vadd.f32 %v5099_v44, %v3283_v39  ;;  %v3341_v55 = vadd.f32 %v5099_v44, %v3285_v10  ;;  %v3209_v13 = vpop.f32.mrf.mxu0  ;;  %v3262_v33 = vpop.f32.mrf.mxu1  ;;  %v3366_v59 = vmax.f32 %v3334_v4, 0.0 }
 0x20a   : > { %v3424_v3 = vadd.f32 %v3423_v15, %v3386_v12  ;;  %v3340_v6 = vadd.f32 %v5099_v44, %v3284_v32  ;;  %v3291_v19 = vadd.f32 %v3209_v13, %v5095_v63  ;;  %v3293_v7 = vadd.f32 %v3262_v33, %v5104_v26  ;;  %v3391_v15 = vld [vmem:[#allocation2] sm:$0xff]  ;;  %v3394_v33 = vld [vmem:[#allocation2 + $0x18] sm:$0xff] }
 0x20b   : > { %v3399_v46 = vadd.f32 %v3398_v23, %v3364_v25  ;;  %v3371_v2 = vmax.f32 %v3339_v27, 0.0  ;;  %v3211_v18 = vpop.f32.mrf.mxu0  ;;  %v3264_v9 = vpop.f32.mrf.mxu1  ;;  %v3342_v40 = vadd.f32 %v5099_v44, %v3286_v21  ;;  %v3373_v58 = vmax.f32 %v3341_v55, 0.0  ;;  %v3392_v23 = vld [vmem:[#allocation2 + $0x8] sm:$0xff]  ;;  %v3393_v21 = vld [vmem:[#allocation2 + $0x10] sm:$0xff] }
 0x20c   : > { %v3372_v61 = vmax.f32 %v3340_v6, 0.0  ;;  %v3347_v28 = vadd.f32 %v5101_v30, %v3291_v19  ;;  %v3292_v37 = vadd.f32 %v3211_v18, %v5108_v51  ;;  %v3349_v16 = vadd.f32 %v5101_v30, %v3293_v7 }
 0x20d   : > { %v3407_v53 = vadd.f32 %v3406_v14, %v3371_v2  ;;  %v3294_v63 = vadd.f32 %v3264_v9, %v5111_v52  ;;  %v3213_v49 = vpop.f32.mrf.mxu0  ;;  %v3266_v26 = vpop.f32.mrf.mxu1  ;;  %v3400_v36 = vadd.f32 %v3399_v46, %v3365_v24  ;;  %v3374_v47 = vmax.f32 %v3342_v40, 0.0 }
 0x20e   : > { %v3379_v8 = vmax.f32 %v3347_v28, 0.0  ;;  %v3348_v60 = vadd.f32 %v5101_v30, %v3292_v37  ;;  %v3299_v57 = vadd.f32 %v3213_v49, %v5118_v45  ;;  %v3301_v31 = vadd.f32 %v3266_v26, %v5133_v56 }
 0x20f   : > { %v3408_v20 = vadd.f32 %v3407_v53, %v3372_v61  ;;  %v3350_v44 = vadd.f32 %v5101_v30, %v3294_v63  ;;  %v3215_v51 = vpop.f32.mrf.mxu0  ;;  %v3268_v14 = vpop.f32.mrf.mxu1  ;;  %v3401_v50 = vadd.f32 %v3400_v36, %v3366_v59  ;;  %v3381_v22 = vmax.f32 %v3349_v16, 0.0 }
 0x210   : > { %v3416_v62 = vadd.f32 %v3415_v34, %v3379_v8  ;;  %v3380_v5 = vmax.f32 %v3348_v60, 0.0  ;;  %v3355_v52 = vadd.f32 %v5121_v29, %v3299_v57  ;;  %v3300_v38 = vadd.f32 %v3215_v51, %v2973_v54 }
 0x211   : > { %v3302_v42 = vadd.f32 %v3268_v14, %v2975_v0  ;;  %3402 = vadd.xlane.f32.xlu0 %v3401_v50  ;;  %v3409_v11 = vadd.f32 %v3408_v20, %v3373_v58  ;;  %v3357_v35 = vadd.f32 %v5121_v29, %v3301_v31  ;;  %v3382_v56 = vmax.f32 %v3350_v44, 0.0 }
 0x212   : > { %v3417_v41 = vadd.f32 %v3416_v62, %v3380_v5  ;;  %v3387_v45 = vmax.f32 %v3355_v52, 0.0  ;;  %v3356_v30 = vadd.f32 %v5121_v29, %v3300_v38 }
 0x213   : > { %v3410_v1 = vadd.f32 %v3409_v11, %v3374_v47  ;;  %v3358_v34 = vadd.f32 %v5121_v29, %v3302_v42  ;;  %v3389_v54 = vmax.f32 %v3357_v35, 0.0 }
 0x214   : > { %v3425_v17 = vadd.f32 %v3424_v3, %v3387_v45  ;;  %v3388_v4 = vmax.f32 %v3356_v30, 0.0  ;;  %v3418_v39 = vadd.f32 %v3417_v41, %v3381_v22 }
 0x215   : > { %3411 = vadd.xlane.f32.xlu1 %v3410_v1  ;;  %v3390_v0 = vmax.f32 %v3358_v34, 0.0 }
 0x216   : > { %v3426_v10 = vadd.f32 %v3425_v17, %v3388_v4  ;;  %v3419_v48 = vadd.f32 %v3418_v39, %v3382_v56 }
 0x218   : > { %3420 = vadd.xlane.f32.xlu0 %v3419_v48  ;;  %v3427_v43 = vadd.f32 %v3426_v10, %v3389_v54 }
 0x21a   : > { %v3428_v12 = vadd.f32 %v3427_v43, %v3390_v0 }
 0x21c   : > { %3429 = vadd.xlane.f32.xlu0 %v3428_v12 }
 0x29a   : > { %v3403_v25 = vpop.xlane.xlu0 %3402 }
 0x29b   : > { %v3431_v32 = vadd.f32 %v3403_v25, %v3391_v15 }
 0x29d   : > { %3436 = vst.msk [vmem:[#allocation2] sm:$0xff] %vm3435_vm4, %v3431_v32 }
 0x29e   : > { %v3412_v27 = vpop.xlane.xlu1 %3411 }
 0x29f   : > { %v3432_v55 = vadd.f32 %v3412_v27, %v3392_v23 }
 0x2a1   : > { %3437 = vst.msk [vmem:[#allocation2 + $0x8] sm:$0xff] %vm3435_vm4, %v3432_v55  ;;  %v3421_v29 = vpop.xlane.xlu0 %3420 }
 0x2a2   : > { %v3433_v13 = vadd.f32 %v3421_v29, %v3393_v21 }
 0x2a4   : > { %3438 = vst.msk [vmem:[#allocation2 + $0x10] sm:$0xff] %vm3435_vm4, %v3433_v13  ;;  %3443 = sbr.rel (%p3774_p10) target bundleno = 1159 (0x487), region = 60 }
 0x2a5   : > { %v3430_v3 = vpop.xlane.xlu0 %3429 }
 0x2a6   : > { %v3434_v6 = vadd.f32 %v3430_v3, %v3394_v33 }
 0x2a8   : > { %3439 = vst.msk [vmem:[#allocation2 + $0x18] sm:$0xff] %vm3435_vm4, %v3434_v6 }
 0x2a9   : > { %v3450_v7 = vld [vmem:[%s5266_s5 + $0x10] sm:$0xff]  ;;  %v3444_v24 = vld [vmem:[#allocation2] sm:$0xff]  ;;  %v3926_v46 = vmov 0   ;;  %v3451_v9 = vld [vmem:[%s5266_s5 + $0x18] sm:$0xff]  ;;  %v5317_v42 = vlaneseq }
 0x2aa   : > { %3865 = vset.pattern.permute.xlu1 %v3926_v46  ;;  %3864 = vset.pattern.permute.xlu0 %v3926_v46  ;;  %v3448_v2 = vld [vmem:[%s5266_s5] sm:$0xff]  ;;  %v3445_v28 = vld [vmem:[#allocation2 + $0x8] sm:$0xff]  ;;  %v3462_v57 = vld [vmem:[%s5267_s6 + $0x10] sm:$0xff] }
 0x2ab   : > { %v3446_v19 = vld [vmem:[#allocation2 + $0x10] sm:$0xff]  ;;  %v3452_v61 = vsub.f32 %v3444_v24, %v3448_v2  ;;  %v3449_v37 = vld [vmem:[%s5266_s5 + $0x8] sm:$0xff]  ;;  %v3460_v8 = vld [vmem:[%s5267_s6] sm:$0xff]  ;;  %v5199_v11 = vand.u32 127, %v5317_v42 }
 0x2ac   : > { %v3454_v59 = vsub.f32 %v3446_v19, %v3450_v7  ;;  %v3453_v16 = vsub.f32 %v3445_v28, %v3449_v37  ;;  %v3461_v60 = vld [vmem:[%s5267_s6 + $0x8] sm:$0xff]  ;;  %v3463_v51 = vld [vmem:[%s5267_s6 + $0x18] sm:$0xff]  ;;  %v3497_v30 = vld [vmem:[%s5268_s7] sm:$0x1] }
 0x2ad   : > { %v3456_v63 = vmul.f32 0.001953125, %v3452_v61  ;;  %vm3526_vm5 = vcmp.ge.s32.totalorder %v5199_v11, 5  ;;  %vm3527_vm6 = vcmp.lt.s32.totalorder %v5199_v11, 8  ;;  %vm3509_vm7 = vcmp.ge.s32.totalorder %v5199_v11, 2 }
 0x2ae   : > { %v3458_v53 = vmul.f32 0.001953125, %v3454_v59  ;;  %v3457_v26 = vmul.f32 0.001953125, %v3453_v16  ;;  %vm3510_vm8 = vcmp.lt.s32.totalorder %v5199_v11, 5  ;;  %vm5208_vm9 = vmand %vm3526_vm5, %vm3527_vm6  ;;  %vm3543_vm10 = vcmp.ge.s32.totalorder %v5199_v11, 8 }
 0x2af   : > { %v3447_v18 = vld [vmem:[#allocation2 + $0x18] sm:$0xff]  ;;  %3466 = vperm.xlu0 %3864, %v3456_v63   ;;  %vm3544_vm11 = vcmp.lt.s32.totalorder %v5199_v11, 11  ;;  %vm5214_vm12 = vmand %vm3509_vm7, %vm3510_vm8  ;;  %vm3501_vm14 = vcmp.lt.s32.totalorder %v5199_v11, 2 }
 0x2b0   : > { %v3455_v40 = vsub.f32 %v3447_v18, %v3451_v9  ;;  %3476 = vperm.xlu1 %3865, %v3458_v53   ;;  %vm5218_vm13 = vmand %vm3543_vm10, %vm3544_vm11 }
 0x2b2   : > { %v3459_v49 = vmul.f32 0.001953125, %v3455_v40 }
 0x2b3   : > { %3471 = vperm.xlu0 %3864, %v3457_v26  }
 0x2b4   : > { %3481 = vperm.xlu1 %3865, %v3459_v49  }
 0x32a   : > { %v3467_v58 = vpop.permute.xlu0 %3466 }
 0x32b   : > { %v3477_v36 = vpop.permute.xlu1 %3476  ;;  %v3484_v44 = vmul.f32 %v3467_v58, %v3460_v8 }
 0x32c   : > { %v3486_v50 = vmul.f32 %v3477_v36, %v3462_v57 }
 0x32e   : > { %v3472_v20 = vpop.permute.xlu0 %3471 }
 0x32f   : > { %v3485_v31 = vmul.f32 %v3472_v20, %v3461_v60  ;;  %v3482_v14 = vpop.permute.xlu1 %3481 }
 0x330   : > { %v3487_v5 = vmul.f32 %v3482_v14, %v3463_v51 }
 0x331   : > { %v3488_v62 = vadd.f32 %v3485_v31, %v3484_v44 }
 0x333   : > { %v3489_v52 = vadd.f32 %v3488_v62, %v3486_v50 }
 0x335   : > { %v3490_v38 = vadd.f32 %v3489_v52, %v3487_v5 }
 0x337   : > { %v3491_v47 = vrot.slane %v3490_v38, 4 }
 0x339   : > { %v3492_v22 = vadd.f32 %v3491_v47, %v3490_v38 }
 0x33b   : > { %v3493_v41 = vrot.slane %v3492_v22, 2 }
 0x33d   : > { %v3494_v45 = vadd.f32 %v3493_v41, %v3492_v22 }
 0x33f   : > { %v3495_v35 = vrot.slane %v3494_v45, 1 }
 0x341   : > { %v3496_v56 = vadd.f32 %v3495_v35, %v3494_v45 }
 0x343   : > { %v3498_v4 = vadd.f32 %v3497_v30, %v3496_v56 }
 0x345   : > { %v3529_v39 = vsel %vm5208_vm9, %v3498_v4, -1e+30  ;;  %v3512_v54 = vsel %vm5214_vm12, %v3498_v4, -1e+30  ;;  %v3546_v0 = vsel %vm5218_vm13, %v3498_v4, -1e+30 }
 0x346   : > { %v3530_v10 = vsel %vm486_vm1, %v3529_v39, -inf  ;;  %v3513_v48 = vsel %vm486_vm1, %v3512_v54, -inf  ;;  %v3547_v43 = vsel %vm486_vm1, %v3546_v0, -inf  ;;  %v3775_v2 = vmul.f32 -1.442695, %v3498_v4 }
 0x347   : > { %3531 = vmax.xlane.f32.xlu1 %v3530_v10  ;;  %3514 = vmax.xlane.f32.xlu0 %v3513_v48 }
 0x34b   : > { %3548 = vmax.xlane.f32.xlu0 %v3547_v43 }
 0x3d0   : > { %v3532_v12 = vpop.xlane.xlu1 %3531  ;;  %v3515_v15 = vpop.xlane.xlu0 %3514 }
 0x3d1   : > { %v3533_v25 = vsub.f32 %v3498_v4, %v3532_v12  ;;  %v3516_v32 = vsub.f32 %v3498_v4, %v3515_v15 }
 0x3d3   : > { %v3534_v23 = vmul.f32 1.442695, %v3533_v25  ;;  %v3517_v27 = vmul.f32 1.442695, %v3516_v32 }
 0x3d4   : > { %v3549_v55 = vpop.xlane.xlu0 %3548 }
 0x3d5   : > { %3866 = vpow2.f32 %v3534_v23  ;;  %v3550_v21 = vsub.f32 %v3498_v4, %v3549_v55 }
 0x3d6   : > { %3868 = vpow2.f32 %v3517_v27 }
 0x3d7   : > { %v3551_v29 = vmul.f32 1.442695, %v3550_v21 }
 0x3d9   : > { %3870 = vpow2.f32 %v3551_v29 }
 0x3da   : > { %3872 = vpow2.f32 %v3775_v2 }
 0x3e2   : > { %v3867_v13 = vpop.eup %3866 }
 0x3e3   : > { %v3869_v33 = vpop.eup %3868  ;;  %v3536_v3 = vsel %vm5208_vm9, %v3867_v13, 0.0 }
 0x3e4   : > { %v3537_v6 = vsel %vm486_vm1, %v3536_v3, 0.0  ;;  %v3519_v19 = vsel %vm5214_vm12, %v3869_v33, 0.0 }
 0x3e5   : > { %3538 = vadd.xlane.f32.xlu1 %v3537_v6  ;;  %v3520_v7 = vsel %vm486_vm1, %v3519_v19, 0.0 }
 0x3e6   : > { %v3871_v24 = vpop.eup %3870  ;;  %3521 = vadd.xlane.f32.xlu0 %v3520_v7 }
 0x3e7   : > { %v3553_v46 = vsel %vm5218_vm13, %v3871_v24, 0.0  ;;  %v3873_v18 = vpop.eup %3872 }
 0x3e8   : > { %v3554_v59 = vsel %vm486_vm1, %v3553_v46, 0.0  ;;  %v3505_v9 = vadd.f32 1.0, %v3873_v18 }
 0x3ea   : > { %3555 = vadd.xlane.f32.xlu0 %v3554_v59  ;;  %3874 = vrcp.f32 %v3505_v9 }
 0x3f7   : > { %v3875_v37 = vpop.eup %3874 }
 0x3f8   : > { %v3508_v49 = vsel %vm3501_vm14, %v3875_v37, 0.0 }
 0x46e   : > { %v3539_v61 = vpop.xlane.xlu1 %3538 }
 0x46f   : > { %3876 = vrcp.f32 %v3539_v61  ;;  %v3522_v40 = vpop.xlane.xlu0 %3521 }
 0x470   : > { %3878 = vrcp.f32 %v3522_v40 }
 0x473   : > { %v3556_v28 = vpop.xlane.xlu0 %3555 }
 0x474   : > { %3880 = vrcp.f32 %v3556_v28 }
 0x47c   : > { %v3877_v53 = vpop.eup %3876 }
 0x47d   : > { %v3879_v16 = vpop.eup %3878  ;;  %v3541_v26 = vmul.f32 %v3877_v53, %v3536_v3 }
 0x47e   : > { %v3524_v63 = vmul.f32 %v3879_v16, %v3519_v19 }
 0x480   : > { %v3525_v36 = vadd.f32 %v3524_v63, %v3508_v49 }
 0x481   : > { %v3881_v58 = vpop.eup %3880 }
 0x482   : > { %v3542_v8 = vadd.f32 %v3541_v26, %v3525_v36  ;;  %v3558_v60 = vmul.f32 %v3881_v58, %v3553_v46 }
 0x484   : > { %v3559_v57 = vadd.f32 %v3558_v60, %v3542_v8 }
 0x486   : > { %3560 = vst [vmem:[%s409_s12] sm:$0x1] %v3559_v57 }
 0x487 PF: > { %s18_s9 = sadd.s32 1, %s3920_s9   ;;  %s5324_s27 = smov %s3912_s29 }
 0x488   : > { %p15_p11 = scmp.ge.s32.totalorder %s18_s9, 18   ;;  %s5325_s28 = smov %s3916_s30 }
 0x489   : > { %s5326_s29 = smov %s5329_s10  ;;  %s5327_s30 = smov %s5333_s11 }
 0x48a   :  { %17 = sbr.rel (!%p15_p11) target bundleno = 3 (0x3), region = 104 }

</bundles_post_ra>
